<compile_context>
chip_gen: v7x
topology: tpu7x:2x2x1
jax: 0.10.0
libtpu: 0.0.40
codegen_flags: <defaults>
</compile_context>

<pallas_src>
import jax
import jax.numpy as jnp
import numpy as np
from jax import lax
from jax.experimental import pallas as pl
from jax.experimental.pallas import tpu as pltpu

LEAKY_SLOPE = 0.2
BN_EPS = 1e-5

LANE = 128
_TARGET_ROWS = 512                  # target im2col rows per grid step (>=512, x8)
_VMEM_BUDGET = 12 * 1024 * 1024     # per-step resident footprint cap (v7x-safe)
_VMEM_LIMIT = 32 * 1024 * 1024      # scoped VMEM limit, valid on v5e/v6e/v7x


def _round_up(x, m):
    return ((x + m - 1) // m) * m


def _tiled_bytes(shape, itemsize):
    """Approximate VMEM bytes of a block after (sublane, lane) tiling."""
    s = list(shape)
    if len(s) == 1:
        s = [1] + s
    s[-1] = _round_up(s[-1], 128)
    s[-2] = _round_up(s[-2], 8 * (4 // itemsize))
    n = 1
    for d in s:
        n *= d
    return n * itemsize


def _pick_batch_block(n, in_tail, cin, ho, wo, coutp, k, y_itemsize):
    """Largest divisor of n whose per-step footprint fits the VMEM budget and
    whose im2col row count does not overshoot the target row tile."""
    best = 1
    for d in range(1, n + 1):
        if n % d:
            continue
        rows = d * ho * wo
        foot = (2 * _tiled_bytes((d,) + in_tail, 2)            # bf16 input, 2-deep
                + 2 * _tiled_bytes((k * k, cin, coutp), 2)     # bf16 weights
                + 2 * _tiled_bytes((d, ho, wo, coutp), y_itemsize)  # output block
                + _tiled_bytes((rows, coutp), 4)               # f32 accumulator
                + 2 * _tiled_bytes((2, coutp), 4))             # stats block
        if foot <= _VMEM_BUDGET and rows <= max(_TARGET_ROWS, ho * wo):
            best = d
    return best


# ---------------------------------------------------------------------------
# Pallas kernels
# ---------------------------------------------------------------------------
def _make_conv_kernel(*, k, s, nb, ho, wo, cin, coutp, fuse_leaky, with_stats):
    """Fused conv (in-VMEM im2col as k*k tap matmuls, f32 accumulate)
    [+ LeakyReLU] [+ per-block BN sum / sum_sq partials]."""
    rows = nb * ho * wo

    def kernel(x_ref, w_ref, *out_refs):
        o_ref = out_refs[0]
        acc = jnp.zeros((rows, coutp), jnp.float32)
        for ky in range(k):
            for kx in range(k):
                if s == 1:
                    # x_ref: (nb, Hp, Wp, cin)
                    tap = x_ref[:, ky:ky + ho, kx:kx + wo, :]
                else:
                    # x_ref: (nb, Hp//s, s, Wp//s, s*cin); phase-split input,
                    # every tap is a static unit-stride slice.
                    hb, hr = divmod(ky, s)
                    wb, wr = divmod(kx, s)
                    tap = x_ref[:, hb:hb + ho, hr,
                                wb:wb + wo, wr * cin:(wr + 1) * cin]
                tap2d = tap.reshape(rows, cin)                 # bf16
                acc = acc + jnp.dot(tap2d, w_ref[ky * k + kx],
                                    preferred_element_type=jnp.float32)
        if with_stats:
            st_ref = out_refs[1]
            st_ref[0, 0, :] = jnp.sum(acc, axis=0)
            st_ref[0, 1, :] = jnp.sum(acc * acc, axis=0)
        y = acc
        if fuse_leaky:
            y = jnp.where(y > 0, y, LEAKY_SLOPE * y)
        o_ref[...] = y.reshape(nb, ho, wo, coutp).astype(o_ref.dtype)

    return kernel


def _bn_act_kernel(y_ref, scale_ref, shift_ref, o_ref):
    # f32 elementwise epilogue (v5e has no bf16 VPU path), bf16 store.
    z = y_ref[...] * scale_ref[...] + shift_ref[...]
    z = jnp.where(z > 0, z, LEAKY_SLOPE * z)
    o_ref[...] = z.astype(o_ref.dtype)


# ---------------------------------------------------------------------------
# Per-layer wrappers
# ---------------------------------------------------------------------------
def _conv_layer(x_nhwc, layer, *, fuse_leaky, with_bn, out_dtype):
    k, s, p = layer["k"], layer["s"], layer["p"]
    coutp = layer["coutp"]
    w = layer["w"]                                  # (k*k, cin_stored, coutp) bf16
    n, h, wdt, cin = x_nhwc.shape
    assert cin == w.shape[1]
    if p:
        x_nhwc = jnp.pad(x_nhwc, ((0, 0), (p, p), (p, p), (0, 0)))
    hp, wp = h + 2 * p, wdt + 2 * p
    ho = (hp - k) // s + 1
    wo = (wp - k) // s + 1

    if s == 1:
        xin = x_nhwc
        tail = (hp, wp, cin)
    else:
        assert hp % s == 0 and wp % s == 0 and k % s == 0
        # free (row-major) reshape: phase-split H and W so strides disappear
        xin = x_nhwc.reshape(n, hp // s, s, wp // s, s * cin)
        tail = (hp // s, s, wp // s, s * cin)

    y_itemsize = jnp.dtype(out_dtype).itemsize
    nb = _pick_batch_block(n, tail, cin, ho, wo, coutp, k, y_itemsize)
    grid = (n // nb,)
    ndim_in = len(tail) + 1

    x_spec = pl.BlockSpec((nb,) + tail, lambda i: (i,) + (0,) * (ndim_in - 1))
    w_spec = pl.BlockSpec(w.shape, lambda i: (0, 0, 0))
    y_spec = pl.BlockSpec((nb, ho, wo, coutp), lambda i: (i, 0, 0, 0))

    out_shape = jax.ShapeDtypeStruct((n, ho, wo, coutp), out_dtype)
    out_specs = y_spec
    if with_bn:
        out_shape = (out_shape,
                     jax.ShapeDtypeStruct((grid[0], 2, coutp), jnp.float32))
        out_specs = (y_spec, pl.BlockSpec((1, 2, coutp), lambda i: (i, 0, 0)))

    kernel = _make_conv_kernel(k=k, s=s, nb=nb, ho=ho, wo=wo, cin=cin,
                               coutp=coutp, fuse_leaky=fuse_leaky,
                               with_stats=with_bn)
    out = pl.pallas_call(
        kernel,
        grid=grid,
        in_specs=[x_spec, w_spec],
        out_specs=out_specs,
        out_shape=out_shape,
        compiler_params=pltpu.CompilerParams(
            dimension_semantics=("parallel",),
            vmem_limit_bytes=_VMEM_LIMIT),
    )(xin, w)
    if with_bn:
        y, stats = out
        return y, stats, nb
    return out, None, nb


def _bn_scale_shift(stats, count, gamma_p, beta_p):
    # Finalize BN batch stats from per-block partials (single-pass sum / sumsq).
    s = jnp.sum(stats[:, 0, :], axis=0)
    sq = jnp.sum(stats[:, 1, :], axis=0)
    mean = s / count
    var = jnp.maximum(sq / count - mean * mean, 0.0)
    scale = gamma_p * lax.rsqrt(var + BN_EPS)
    shift = beta_p - mean * scale
    return scale.reshape(1, -1), shift.reshape(1, -1)


def _bn_act_layer(y, scale, shift, nb):
    n, ho, wo, coutp = y.shape
    grid = (n // nb,)
    blk = pl.BlockSpec((nb, ho, wo, coutp), lambda i: (i, 0, 0, 0))
    vec = pl.BlockSpec((1, coutp), lambda i: (0, 0))
    return pl.pallas_call(
        _bn_act_kernel,
        grid=grid,
        in_specs=[blk, vec, vec],
        out_specs=blk,
        out_shape=jax.ShapeDtypeStruct((n, ho, wo, coutp), jnp.bfloat16),
        compiler_params=pltpu.CompilerParams(
            dimension_semantics=("parallel",),
            vmem_limit_bytes=_VMEM_LIMIT),
    )(y, scale, shift)


# ---------------------------------------------------------------------------
# Parameter construction (mirrors Discriminator.__init__; weights are repacked
# and lane-padded ONCE here, not per forward call)
# ---------------------------------------------------------------------------
def init_discriminator_params(key, isize, nc, ndf, n_extra_layers=0):
    assert isize % 16 == 0, "isize has to be a multiple of 16"
    keys = iter(jax.random.split(key, 64))

    def make_conv(cin_real, cin_stored, cout, ksz):
        w = jax.random.normal(next(keys), (cout, cin_real, ksz, ksz),
                              jnp.float32) * 0.02            # DCGAN-style init
        coutp = _round_up(cout, LANE)
        wk = jnp.transpose(w, (2, 3, 1, 0)).reshape(ksz * ksz, cin_real, cout)
        wk = jnp.pad(wk, ((0, 0), (0, cin_stored - cin_real),
                          (0, coutp - cout))).astype(jnp.bfloat16)
        return w, wk, coutp

    layers = []
    # initial: Conv(nc, ndf, 4, 2, 1) + LeakyReLU
    w32, wk, coutp = make_conv(nc, nc, ndf, 4)
    layers.append(dict(kind="conv_leaky", k=4, s=2, p=1, cout=ndf,
                       coutp=coutp, w=wk, w_oihw=w32))
    stored = coutp
    csize, cndf = isize // 2, ndf
    # extra layers: Conv(cndf, cndf, 3, 1, 1) + BN + LeakyReLU
    for _ in range(n_extra_layers):
        w32, wk, coutp = make_conv(cndf, stored, cndf, 3)
        layers.append(dict(kind="conv_bn_leaky", k=3, s=1, p=1, cout=cndf,
                           coutp=coutp, w=wk, w_oihw=w32,
                           gamma=jnp.ones((cndf,), jnp.float32),
                           beta=jnp.zeros((cndf,), jnp.float32)))
        stored = coutp
    # pyramid: Conv(cndf, 2*cndf, 4, 2, 1) + BN + LeakyReLU
    while csize > 4:
        in_feat, out_feat = cndf, cndf * 2
        w32, wk, coutp = make_conv(in_feat, stored, out_feat, 4)
        layers.append(dict(kind="conv_bn_leaky", k=4, s=2, p=1, cout=out_feat,
                           coutp=coutp, w=wk, w_oihw=w32,
                           gamma=jnp.ones((out_feat,), jnp.float32),
                           beta=jnp.zeros((out_feat,), jnp.float32)))
        stored = coutp
        csize //= 2
        cndf = out_feat
    # output: Conv(cndf, 1, 4, 1, 0)
    w32, wk, coutp = make_conv(cndf, stored, 1, 4)
    layers.append(dict(kind="conv", k=4, s=1, p=0, cout=1,
                       coutp=coutp, w=wk, w_oihw=w32))
    return layers


# ---------------------------------------------------------------------------
# Forward pass
# ---------------------------------------------------------------------------
def discriminator_forward(params, x_nchw):
    x = jnp.transpose(x_nchw, (0, 2, 3, 1)).astype(jnp.bfloat16)   # NHWC bf16
    for layer in params:
        kind = layer["kind"]
        if kind == "conv_leaky":
            x, _, _ = _conv_layer(x, layer, fuse_leaky=True, with_bn=False,
                                  out_dtype=jnp.bfloat16)
        elif kind == "conv_bn_leaky":
            y, stats, nb = _conv_layer(x, layer, fuse_leaky=False, with_bn=True,
                                       out_dtype=jnp.float32)
            n, ho, wo, coutp = y.shape
            pad = coutp - layer["cout"]
            gamma_p = jnp.pad(layer["gamma"], (0, pad))   # padded ch -> scale 0
            beta_p = jnp.pad(layer["beta"], (0, pad))
            scale, shift = _bn_scale_shift(stats, n * ho * wo, gamma_p, beta_p)
            x = _bn_act_layer(y, scale, shift, nb)
        else:  # plain output conv
            x, _, _ = _conv_layer(x, layer, fuse_leaky=False, with_bn=False,
                                  out_dtype=jnp.float32)
    out = x[..., :1].astype(jnp.float32)     # drop lane padding of final conv
    return jnp.transpose(out, (0, 3, 1, 2))  # NCHW, shape (N, 1, 1, 1)


# ---------------------------------------------------------------------------
# Pure-JAX reference (matches the Pallas numerics: bf16 matmul inputs,
# f32 accumulate, training-mode batch-norm stats, bf16 activation storage)
# ---------------------------------------------------------------------------
def reference_forward(params, x_nchw):
    x = x_nchw
    for layer in params:
        lhs = x.astype(jnp.bfloat16)
        rhs = layer["w_oihw"].astype(jnp.bfloat16)
        y = lax.conv_general_dilated(
            lhs, rhs, (layer["s"], layer["s"]),
            [(layer["p"], layer["p"]), (layer["p"], layer["p"])],
            dimension_numbers=("NCHW", "OIHW", "NCHW"),
            preferred_element_type=jnp.float32)
        if layer["kind"] == "conv_bn_leaky":
            mean = jnp.mean(y, axis=(0, 2, 3), keepdims=True)
            var = jnp.mean((y - mean) ** 2, axis=(0, 2, 3), keepdims=True)
            y = (y - mean) * lax.rsqrt(var + BN_EPS)
            y = (y * layer["gamma"].reshape(1, -1, 1, 1)
                 + layer["beta"].reshape(1, -1, 1, 1))
        if layer["kind"] in ("conv_leaky", "conv_bn_leaky"):
            y = jnp.where(y > 0, y, LEAKY_SLOPE * y)
            # mirror the bf16 activation storage used by the Pallas path
            y = y.astype(jnp.bfloat16).astype(jnp.float32)
        x = y
    return x


if __name__ == "__main__":
    # small shapes consistent with the module: isize multiple of 16
    isize, nc, ndf, n_extra = 16, 4, 16, 0
    N = 2
    key = jax.random.PRNGKey(0)
    k_x, k_p = jax.random.split(key)
    x = jax.random.normal(k_x, (N, nc, isize, isize), jnp.float32)

    params = init_discriminator_params(k_p, isize, nc, ndf, n_extra)

    out = jax.block_until_ready(discriminator_forward(params, x))
    assert out.shape == (N, 1, 1, 1), out.shape

    ref = jax.block_until_ready(reference_forward(params, x))
    np.testing.assert_allclose(np.asarray(out), np.asarray(ref),
                               rtol=2e-2, atol=2e-3)
    print("KERNEL_OK")
</pallas_src>

<mosaic_0001>
module attributes {stable_mosaic.version = 11 : i64} {
  func.func @kernel(%arg0: i32, %arg1: memref<2x9x2x9x8xbf16, #tpu.memory_space<vmem>>, %arg2: memref<16x4x128xbf16, #tpu.memory_space<vmem>>, %arg3: memref<2x8x8x128xbf16, #tpu.memory_space<vmem>>) attributes {dimension_semantics = [#tpu.dimension_semantics<parallel>], iteration_bounds = array<i64: 1>, scalar_prefetch = 0 : i64, scratch_operands = 0 : i64, tpu.core_type = #tpu.core_type<tc>, window_params = [{transform_indices = @transform_0, window_bounds = array<i64: 2, 9, 2, 9, 8>}, {pipeline_mode = #tpu.pipeline_mode<synchronous>, transform_indices = @transform_1, window_bounds = array<i64: 16, 4, 128>}, {transform_indices = @transform_2, window_bounds = array<i64: 2, 8, 8, 128>}]} {
    %cst = arith.constant 0.000000e+00 : f32
    %0 = vector.broadcast %cst : f32 to vector<128x128xf32>
    %c0 = arith.constant 0 : index
    %c0_0 = arith.constant 0 : index
    %c0_1 = arith.constant 0 : index
    %c0_2 = arith.constant 0 : index
    %c0_3 = arith.constant 0 : index
    %1 = vector.load %arg1[%c0, %c0_0, %c0_1, %c0_2, %c0_3] : memref<2x9x2x9x8xbf16, #tpu.memory_space<vmem>>, vector<2x8x1x8x4xbf16>
    %2 = vector.shape_cast %1 : vector<2x8x1x8x4xbf16> to vector<2x8x8x4xbf16>
    %3 = vector.shape_cast %2 : vector<2x8x8x4xbf16> to vector<128x4xbf16>
    %c0_4 = arith.constant 0 : index
    %c0_5 = arith.constant 0 : index
    %c0_6 = arith.constant 0 : index
    %4 = vector.load %arg2[%c0_4, %c0_5, %c0_6] : memref<16x4x128xbf16, #tpu.memory_space<vmem>>, vector<1x4x128xbf16>
    %5 = vector.shape_cast %4 : vector<1x4x128xbf16> to vector<4x128xbf16>
    %cst_7 = arith.constant dense<0.000000e+00> : vector<128x128xf32>
    %6 = tpu.matmul %3, %5, %cst_7 {dimension_numbers = #tpu.dot_dimension_numbers<[1], [0], [0], [1], [0, 0, 1, 1], [], []>} : vector<128x4xbf16>, vector<4x128xbf16>, vector<128x128xf32> -> vector<128x128xf32>
    %7 = arith.addf %0, %6 : vector<128x128xf32>
    %c0_8 = arith.constant 0 : index
    %c0_9 = arith.constant 0 : index
    %c0_10 = arith.constant 0 : index
    %c0_11 = arith.constant 0 : index
    %c4 = arith.constant 4 : index
    %8 = vector.load %arg1[%c0_8, %c0_9, %c0_10, %c0_11, %c4] : memref<2x9x2x9x8xbf16, #tpu.memory_space<vmem>>, vector<2x8x1x8x4xbf16>
    %9 = vector.shape_cast %8 : vector<2x8x1x8x4xbf16> to vector<2x8x8x4xbf16>
    %10 = vector.shape_cast %9 : vector<2x8x8x4xbf16> to vector<128x4xbf16>
    %c1 = arith.constant 1 : index
    %c0_12 = arith.constant 0 : index
    %c0_13 = arith.constant 0 : index
    %11 = vector.load %arg2[%c1, %c0_12, %c0_13] : memref<16x4x128xbf16, #tpu.memory_space<vmem>>, vector<1x4x128xbf16>
    %12 = vector.shape_cast %11 : vector<1x4x128xbf16> to vector<4x128xbf16>
    %cst_14 = arith.constant dense<0.000000e+00> : vector<128x128xf32>
    %13 = tpu.matmul %10, %12, %cst_14 {dimension_numbers = #tpu.dot_dimension_numbers<[1], [0], [0], [1], [0, 0, 1, 1], [], []>} : vector<128x4xbf16>, vector<4x128xbf16>, vector<128x128xf32> -> vector<128x128xf32>
    %14 = arith.addf %7, %13 : vector<128x128xf32>
    %c0_15 = arith.constant 0 : index
    %c0_16 = arith.constant 0 : index
    %c0_17 = arith.constant 0 : index
    %c1_18 = arith.constant 1 : index
    %c0_19 = arith.constant 0 : index
    %15 = vector.load %arg1[%c0_15, %c0_16, %c0_17, %c1_18, %c0_19] : memref<2x9x2x9x8xbf16, #tpu.memory_space<vmem>>, vector<2x8x1x8x4xbf16>
    %16 = vector.shape_cast %15 : vector<2x8x1x8x4xbf16> to vector<2x8x8x4xbf16>
    %17 = vector.shape_cast %16 : vector<2x8x8x4xbf16> to vector<128x4xbf16>
    %c2 = arith.constant 2 : index
    %c0_20 = arith.constant 0 : index
    %c0_21 = arith.constant 0 : index
    %18 = vector.load %arg2[%c2, %c0_20, %c0_21] : memref<16x4x128xbf16, #tpu.memory_space<vmem>>, vector<1x4x128xbf16>
    %19 = vector.shape_cast %18 : vector<1x4x128xbf16> to vector<4x128xbf16>
    %cst_22 = arith.constant dense<0.000000e+00> : vector<128x128xf32>
    %20 = tpu.matmul %17, %19, %cst_22 {dimension_numbers = #tpu.dot_dimension_numbers<[1], [0], [0], [1], [0, 0, 1, 1], [], []>} : vector<128x4xbf16>, vector<4x128xbf16>, vector<128x128xf32> -> vector<128x128xf32>
    %21 = arith.addf %14, %20 : vector<128x128xf32>
    %c0_23 = arith.constant 0 : index
    %c0_24 = arith.constant 0 : index
    %c0_25 = arith.constant 0 : index
    %c1_26 = arith.constant 1 : index
    %c4_27 = arith.constant 4 : index
    %22 = vector.load %arg1[%c0_23, %c0_24, %c0_25, %c1_26, %c4_27] : memref<2x9x2x9x8xbf16, #tpu.memory_space<vmem>>, vector<2x8x1x8x4xbf16>
    %23 = vector.shape_cast %22 : vector<2x8x1x8x4xbf16> to vector<2x8x8x4xbf16>
    %24 = vector.shape_cast %23 : vector<2x8x8x4xbf16> to vector<128x4xbf16>
    %c3 = arith.constant 3 : index
    %c0_28 = arith.constant 0 : index
    %c0_29 = arith.constant 0 : index
    %25 = vector.load %arg2[%c3, %c0_28, %c0_29] : memref<16x4x128xbf16, #tpu.memory_space<vmem>>, vector<1x4x128xbf16>
    %26 = vector.shape_cast %25 : vector<1x4x128xbf16> to vector<4x128xbf16>
    %cst_30 = arith.constant dense<0.000000e+00> : vector<128x128xf32>
    %27 = tpu.matmul %24, %26, %cst_30 {dimension_numbers = #tpu.dot_dimension_numbers<[1], [0], [0], [1], [0, 0, 1, 1], [], []>} : vector<128x4xbf16>, vector<4x128xbf16>, vector<128x128xf32> -> vector<128x128xf32>
    %28 = arith.addf %21, %27 : vector<128x128xf32>
    %c0_31 = arith.constant 0 : index
    %c0_32 = arith.constant 0 : index
    %c1_33 = arith.constant 1 : index
    %c0_34 = arith.constant 0 : index
    %c0_35 = arith.constant 0 : index
    %29 = vector.load %arg1[%c0_31, %c0_32, %c1_33, %c0_34, %c0_35] : memref<2x9x2x9x8xbf16, #tpu.memory_space<vmem>>, vector<2x8x1x8x4xbf16>
    %30 = vector.shape_cast %29 : vector<2x8x1x8x4xbf16> to vector<2x8x8x4xbf16>
    %31 = vector.shape_cast %30 : vector<2x8x8x4xbf16> to vector<128x4xbf16>
    %c4_36 = arith.constant 4 : index
    %c0_37 = arith.constant 0 : index
    %c0_38 = arith.constant 0 : index
    %32 = vector.load %arg2[%c4_36, %c0_37, %c0_38] : memref<16x4x128xbf16, #tpu.memory_space<vmem>>, vector<1x4x128xbf16>
    %33 = vector.shape_cast %32 : vector<1x4x128xbf16> to vector<4x128xbf16>
    %cst_39 = arith.constant dense<0.000000e+00> : vector<128x128xf32>
    %34 = tpu.matmul %31, %33, %cst_39 {dimension_numbers = #tpu.dot_dimension_numbers<[1], [0], [0], [1], [0, 0, 1, 1], [], []>} : vector<128x4xbf16>, vector<4x128xbf16>, vector<128x128xf32> -> vector<128x128xf32>
    %35 = arith.addf %28, %34 : vector<128x128xf32>
    %c0_40 = arith.constant 0 : index
    %c0_41 = arith.constant 0 : index
    %c1_42 = arith.constant 1 : index
    %c0_43 = arith.constant 0 : index
    %c4_44 = arith.constant 4 : index
    %36 = vector.load %arg1[%c0_40, %c0_41, %c1_42, %c0_43, %c4_44] : memref<2x9x2x9x8xbf16, #tpu.memory_space<vmem>>, vector<2x8x1x8x4xbf16>
    %37 = vector.shape_cast %36 : vector<2x8x1x8x4xbf16> to vector<2x8x8x4xbf16>
    %38 = vector.shape_cast %37 : vector<2x8x8x4xbf16> to vector<128x4xbf16>
    %c5 = arith.constant 5 : index
    %c0_45 = arith.constant 0 : index
    %c0_46 = arith.constant 0 : index
    %39 = vector.load %arg2[%c5, %c0_45, %c0_46] : memref<16x4x128xbf16, #tpu.memory_space<vmem>>, vector<1x4x128xbf16>
    %40 = vector.shape_cast %39 : vector<1x4x128xbf16> to vector<4x128xbf16>
    %cst_47 = arith.constant dense<0.000000e+00> : vector<128x128xf32>
    %41 = tpu.matmul %38, %40, %cst_47 {dimension_numbers = #tpu.dot_dimension_numbers<[1], [0], [0], [1], [0, 0, 1, 1], [], []>} : vector<128x4xbf16>, vector<4x128xbf16>, vector<128x128xf32> -> vector<128x128xf32>
    %42 = arith.addf %35, %41 : vector<128x128xf32>
    %c0_48 = arith.constant 0 : index
    %c0_49 = arith.constant 0 : index
    %c1_50 = arith.constant 1 : index
    %c1_51 = arith.constant 1 : index
    %c0_52 = arith.constant 0 : index
    %43 = vector.load %arg1[%c0_48, %c0_49, %c1_50, %c1_51, %c0_52] : memref<2x9x2x9x8xbf16, #tpu.memory_space<vmem>>, vector<2x8x1x8x4xbf16>
    %44 = vector.shape_cast %43 : vector<2x8x1x8x4xbf16> to vector<2x8x8x4xbf16>
    %45 = vector.shape_cast %44 : vector<2x8x8x4xbf16> to vector<128x4xbf16>
    %c6 = arith.constant 6 : index
    %c0_53 = arith.constant 0 : index
    %c0_54 = arith.constant 0 : index
    %46 = vector.load %arg2[%c6, %c0_53, %c0_54] : memref<16x4x128xbf16, #tpu.memory_space<vmem>>, vector<1x4x128xbf16>
    %47 = vector.shape_cast %46 : vector<1x4x128xbf16> to vector<4x128xbf16>
    %cst_55 = arith.constant dense<0.000000e+00> : vector<128x128xf32>
    %48 = tpu.matmul %45, %47, %cst_55 {dimension_numbers = #tpu.dot_dimension_numbers<[1], [0], [0], [1], [0, 0, 1, 1], [], []>} : vector<128x4xbf16>, vector<4x128xbf16>, vector<128x128xf32> -> vector<128x128xf32>
    %49 = arith.addf %42, %48 : vector<128x128xf32>
    %c0_56 = arith.constant 0 : index
    %c0_57 = arith.constant 0 : index
    %c1_58 = arith.constant 1 : index
    %c1_59 = arith.constant 1 : index
    %c4_60 = arith.constant 4 : index
    %50 = vector.load %arg1[%c0_56, %c0_57, %c1_58, %c1_59, %c4_60] : memref<2x9x2x9x8xbf16, #tpu.memory_space<vmem>>, vector<2x8x1x8x4xbf16>
    %51 = vector.shape_cast %50 : vector<2x8x1x8x4xbf16> to vector<2x8x8x4xbf16>
    %52 = vector.shape_cast %51 : vector<2x8x8x4xbf16> to vector<128x4xbf16>
    %c7 = arith.constant 7 : index
    %c0_61 = arith.constant 0 : index
    %c0_62 = arith.constant 0 : index
    %53 = vector.load %arg2[%c7, %c0_61, %c0_62] : memref<16x4x128xbf16, #tpu.memory_space<vmem>>, vector<1x4x128xbf16>
    %54 = vector.shape_cast %53 : vector<1x4x128xbf16> to vector<4x128xbf16>
    %cst_63 = arith.constant dense<0.000000e+00> : vector<128x128xf32>
    %55 = tpu.matmul %52, %54, %cst_63 {dimension_numbers = #tpu.dot_dimension_numbers<[1], [0], [0], [1], [0, 0, 1, 1], [], []>} : vector<128x4xbf16>, vector<4x128xbf16>, vector<128x128xf32> -> vector<128x128xf32>
    %56 = arith.addf %49, %55 : vector<128x128xf32>
    %c0_64 = arith.constant 0 : index
    %c1_65 = arith.constant 1 : index
    %c0_66 = arith.constant 0 : index
    %c0_67 = arith.constant 0 : index
    %c0_68 = arith.constant 0 : index
    %57 = vector.load %arg1[%c0_64, %c1_65, %c0_66, %c0_67, %c0_68] : memref<2x9x2x9x8xbf16, #tpu.memory_space<vmem>>, vector<2x8x1x8x4xbf16>
    %58 = vector.shape_cast %57 : vector<2x8x1x8x4xbf16> to vector<2x8x8x4xbf16>
    %59 = vector.shape_cast %58 : vector<2x8x8x4xbf16> to vector<128x4xbf16>
    %c8 = arith.constant 8 : index
    %c0_69 = arith.constant 0 : index
    %c0_70 = arith.constant 0 : index
    %60 = vector.load %arg2[%c8, %c0_69, %c0_70] : memref<16x4x128xbf16, #tpu.memory_space<vmem>>, vector<1x4x128xbf16>
    %61 = vector.shape_cast %60 : vector<1x4x128xbf16> to vector<4x128xbf16>
    %cst_71 = arith.constant dense<0.000000e+00> : vector<128x128xf32>
    %62 = tpu.matmul %59, %61, %cst_71 {dimension_numbers = #tpu.dot_dimension_numbers<[1], [0], [0], [1], [0, 0, 1, 1], [], []>} : vector<128x4xbf16>, vector<4x128xbf16>, vector<128x128xf32> -> vector<128x128xf32>
    %63 = arith.addf %56, %62 : vector<128x128xf32>
    %c0_72 = arith.constant 0 : index
    %c1_73 = arith.constant 1 : index
    %c0_74 = arith.constant 0 : index
    %c0_75 = arith.constant 0 : index
    %c4_76 = arith.constant 4 : index
    %64 = vector.load %arg1[%c0_72, %c1_73, %c0_74, %c0_75, %c4_76] : memref<2x9x2x9x8xbf16, #tpu.memory_space<vmem>>, vector<2x8x1x8x4xbf16>
    %65 = vector.shape_cast %64 : vector<2x8x1x8x4xbf16> to vector<2x8x8x4xbf16>
    %66 = vector.shape_cast %65 : vector<2x8x8x4xbf16> to vector<128x4xbf16>
    %c9 = arith.constant 9 : index
    %c0_77 = arith.constant 0 : index
    %c0_78 = arith.constant 0 : index
    %67 = vector.load %arg2[%c9, %c0_77, %c0_78] : memref<16x4x128xbf16, #tpu.memory_space<vmem>>, vector<1x4x128xbf16>
    %68 = vector.shape_cast %67 : vector<1x4x128xbf16> to vector<4x128xbf16>
    %cst_79 = arith.constant dense<0.000000e+00> : vector<128x128xf32>
    %69 = tpu.matmul %66, %68, %cst_79 {dimension_numbers = #tpu.dot_dimension_numbers<[1], [0], [0], [1], [0, 0, 1, 1], [], []>} : vector<128x4xbf16>, vector<4x128xbf16>, vector<128x128xf32> -> vector<128x128xf32>
    %70 = arith.addf %63, %69 : vector<128x128xf32>
    %c0_80 = arith.constant 0 : index
    %c1_81 = arith.constant 1 : index
    %c0_82 = arith.constant 0 : index
    %c1_83 = arith.constant 1 : index
    %c0_84 = arith.constant 0 : index
    %71 = vector.load %arg1[%c0_80, %c1_81, %c0_82, %c1_83, %c0_84] : memref<2x9x2x9x8xbf16, #tpu.memory_space<vmem>>, vector<2x8x1x8x4xbf16>
    %72 = vector.shape_cast %71 : vector<2x8x1x8x4xbf16> to vector<2x8x8x4xbf16>
    %73 = vector.shape_cast %72 : vector<2x8x8x4xbf16> to vector<128x4xbf16>
    %c10 = arith.constant 10 : index
    %c0_85 = arith.constant 0 : index
    %c0_86 = arith.constant 0 : index
    %74 = vector.load %arg2[%c10, %c0_85, %c0_86] : memref<16x4x128xbf16, #tpu.memory_space<vmem>>, vector<1x4x128xbf16>
    %75 = vector.shape_cast %74 : vector<1x4x128xbf16> to vector<4x128xbf16>
    %cst_87 = arith.constant dense<0.000000e+00> : vector<128x128xf32>
    %76 = tpu.matmul %73, %75, %cst_87 {dimension_numbers = #tpu.dot_dimension_numbers<[1], [0], [0], [1], [0, 0, 1, 1], [], []>} : vector<128x4xbf16>, vector<4x128xbf16>, vector<128x128xf32> -> vector<128x128xf32>
    %77 = arith.addf %70, %76 : vector<128x128xf32>
    %c0_88 = arith.constant 0 : index
    %c1_89 = arith.constant 1 : index
    %c0_90 = arith.constant 0 : index
    %c1_91 = arith.constant 1 : index
    %c4_92 = arith.constant 4 : index
    %78 = vector.load %arg1[%c0_88, %c1_89, %c0_90, %c1_91, %c4_92] : memref<2x9x2x9x8xbf16, #tpu.memory_space<vmem>>, vector<2x8x1x8x4xbf16>
    %79 = vector.shape_cast %78 : vector<2x8x1x8x4xbf16> to vector<2x8x8x4xbf16>
    %80 = vector.shape_cast %79 : vector<2x8x8x4xbf16> to vector<128x4xbf16>
    %c11 = arith.constant 11 : index
    %c0_93 = arith.constant 0 : index
    %c0_94 = arith.constant 0 : index
    %81 = vector.load %arg2[%c11, %c0_93, %c0_94] : memref<16x4x128xbf16, #tpu.memory_space<vmem>>, vector<1x4x128xbf16>
    %82 = vector.shape_cast %81 : vector<1x4x128xbf16> to vector<4x128xbf16>
    %cst_95 = arith.constant dense<0.000000e+00> : vector<128x128xf32>
    %83 = tpu.matmul %80, %82, %cst_95 {dimension_numbers = #tpu.dot_dimension_numbers<[1], [0], [0], [1], [0, 0, 1, 1], [], []>} : vector<128x4xbf16>, vector<4x128xbf16>, vector<128x128xf32> -> vector<128x128xf32>
    %84 = arith.addf %77, %83 : vector<128x128xf32>
    %c0_96 = arith.constant 0 : index
    %c1_97 = arith.constant 1 : index
    %c1_98 = arith.constant 1 : index
    %c0_99 = arith.constant 0 : index
    %c0_100 = arith.constant 0 : index
    %85 = vector.load %arg1[%c0_96, %c1_97, %c1_98, %c0_99, %c0_100] : memref<2x9x2x9x8xbf16, #tpu.memory_space<vmem>>, vector<2x8x1x8x4xbf16>
    %86 = vector.shape_cast %85 : vector<2x8x1x8x4xbf16> to vector<2x8x8x4xbf16>
    %87 = vector.shape_cast %86 : vector<2x8x8x4xbf16> to vector<128x4xbf16>
    %c12 = arith.constant 12 : index
    %c0_101 = arith.constant 0 : index
    %c0_102 = arith.constant 0 : index
    %88 = vector.load %arg2[%c12, %c0_101, %c0_102] : memref<16x4x128xbf16, #tpu.memory_space<vmem>>, vector<1x4x128xbf16>
    %89 = vector.shape_cast %88 : vector<1x4x128xbf16> to vector<4x128xbf16>
    %cst_103 = arith.constant dense<0.000000e+00> : vector<128x128xf32>
    %90 = tpu.matmul %87, %89, %cst_103 {dimension_numbers = #tpu.dot_dimension_numbers<[1], [0], [0], [1], [0, 0, 1, 1], [], []>} : vector<128x4xbf16>, vector<4x128xbf16>, vector<128x128xf32> -> vector<128x128xf32>
    %91 = arith.addf %84, %90 : vector<128x128xf32>
    %c0_104 = arith.constant 0 : index
    %c1_105 = arith.constant 1 : index
    %c1_106 = arith.constant 1 : index
    %c0_107 = arith.constant 0 : index
    %c4_108 = arith.constant 4 : index
    %92 = vector.load %arg1[%c0_104, %c1_105, %c1_106, %c0_107, %c4_108] : memref<2x9x2x9x8xbf16, #tpu.memory_space<vmem>>, vector<2x8x1x8x4xbf16>
    %93 = vector.shape_cast %92 : vector<2x8x1x8x4xbf16> to vector<2x8x8x4xbf16>
    %94 = vector.shape_cast %93 : vector<2x8x8x4xbf16> to vector<128x4xbf16>
    %c13 = arith.constant 13 : index
    %c0_109 = arith.constant 0 : index
    %c0_110 = arith.constant 0 : index
    %95 = vector.load %arg2[%c13, %c0_109, %c0_110] : memref<16x4x128xbf16, #tpu.memory_space<vmem>>, vector<1x4x128xbf16>
    %96 = vector.shape_cast %95 : vector<1x4x128xbf16> to vector<4x128xbf16>
    %cst_111 = arith.constant dense<0.000000e+00> : vector<128x128xf32>
    %97 = tpu.matmul %94, %96, %cst_111 {dimension_numbers = #tpu.dot_dimension_numbers<[1], [0], [0], [1], [0, 0, 1, 1], [], []>} : vector<128x4xbf16>, vector<4x128xbf16>, vector<128x128xf32> -> vector<128x128xf32>
    %98 = arith.addf %91, %97 : vector<128x128xf32>
    %c0_112 = arith.constant 0 : index
    %c1_113 = arith.constant 1 : index
    %c1_114 = arith.constant 1 : index
    %c1_115 = arith.constant 1 : index
    %c0_116 = arith.constant 0 : index
    %99 = vector.load %arg1[%c0_112, %c1_113, %c1_114, %c1_115, %c0_116] : memref<2x9x2x9x8xbf16, #tpu.memory_space<vmem>>, vector<2x8x1x8x4xbf16>
    %100 = vector.shape_cast %99 : vector<2x8x1x8x4xbf16> to vector<2x8x8x4xbf16>
    %101 = vector.shape_cast %100 : vector<2x8x8x4xbf16> to vector<128x4xbf16>
    %c14 = arith.constant 14 : index
    %c0_117 = arith.constant 0 : index
    %c0_118 = arith.constant 0 : index
    %102 = vector.load %arg2[%c14, %c0_117, %c0_118] : memref<16x4x128xbf16, #tpu.memory_space<vmem>>, vector<1x4x128xbf16>
    %103 = vector.shape_cast %102 : vector<1x4x128xbf16> to vector<4x128xbf16>
    %cst_119 = arith.constant dense<0.000000e+00> : vector<128x128xf32>
    %104 = tpu.matmul %101, %103, %cst_119 {dimension_numbers = #tpu.dot_dimension_numbers<[1], [0], [0], [1], [0, 0, 1, 1], [], []>} : vector<128x4xbf16>, vector<4x128xbf16>, vector<128x128xf32> -> vector<128x128xf32>
    %105 = arith.addf %98, %104 : vector<128x128xf32>
    %c0_120 = arith.constant 0 : index
    %c1_121 = arith.constant 1 : index
    %c1_122 = arith.constant 1 : index
    %c1_123 = arith.constant 1 : index
    %c4_124 = arith.constant 4 : index
    %106 = vector.load %arg1[%c0_120, %c1_121, %c1_122, %c1_123, %c4_124] : memref<2x9x2x9x8xbf16, #tpu.memory_space<vmem>>, vector<2x8x1x8x4xbf16>
    %107 = vector.shape_cast %106 : vector<2x8x1x8x4xbf16> to vector<2x8x8x4xbf16>
    %108 = vector.shape_cast %107 : vector<2x8x8x4xbf16> to vector<128x4xbf16>
    %c15 = arith.constant 15 : index
    %c0_125 = arith.constant 0 : index
    %c0_126 = arith.constant 0 : index
    %109 = vector.load %arg2[%c15, %c0_125, %c0_126] : memref<16x4x128xbf16, #tpu.memory_space<vmem>>, vector<1x4x128xbf16>
    %110 = vector.shape_cast %109 : vector<1x4x128xbf16> to vector<4x128xbf16>
    %cst_127 = arith.constant dense<0.000000e+00> : vector<128x128xf32>
    %111 = tpu.matmul %108, %110, %cst_127 {dimension_numbers = #tpu.dot_dimension_numbers<[1], [0], [0], [1], [0, 0, 1, 1], [], []>} : vector<128x4xbf16>, vector<4x128xbf16>, vector<128x128xf32> -> vector<128x128xf32>
    %112 = arith.addf %105, %111 : vector<128x128xf32>
    %cst_128 = arith.constant 0.000000e+00 : f32
    %113 = vector.broadcast %cst_128 : f32 to vector<128x128xf32>
    %114 = arith.cmpf ogt, %112, %113 : vector<128x128xf32>
    %cst_129 = arith.constant 2.000000e-01 : f32
    %115 = vector.broadcast %cst_129 : f32 to vector<128x128xf32>
    %116 = arith.mulf %115, %112 : vector<128x128xf32>
    %117 = arith.select %114, %112, %116 : vector<128x128xi1>, vector<128x128xf32>
    %118 = vector.shape_cast %117 : vector<128x128xf32> to vector<2x8x8x128xf32>
    %119 = arith.truncf %118 : vector<2x8x8x128xf32> to vector<2x8x8x128xbf16>
    %c0_130 = arith.constant 0 : index
    %c0_131 = arith.constant 0 : index
    %c0_132 = arith.constant 0 : index
    %c0_133 = arith.constant 0 : index
    %120 = vector.load %arg3[%c0_130, %c0_131, %c0_132, %c0_133] : memref<2x8x8x128xbf16, #tpu.memory_space<vmem>>, vector<2x8x8x128xbf16>
    tpu.vector_store %arg3[%c0_130, %c0_131, %c0_132, %c0_133], %119 {strides = array<i32>} : memref<2x8x8x128xbf16, #tpu.memory_space<vmem>>, vector<2x8x8x128xbf16>,
    return
  }
  func.func @transform_0(%arg0: i32) -> (i32, i32, i32, i32, i32) {
    %c0_i32 = arith.constant 0 : i32
    %c0_i32_0 = arith.constant 0 : i32
    %c0_i32_1 = arith.constant 0 : i32
    %c0_i32_2 = arith.constant 0 : i32
    %c0_i32_3 = arith.constant 0 : i32
    return %arg0, %c0_i32, %c0_i32_0, %c0_i32_1, %c0_i32_2 : i32, i32, i32, i32, i32
  }
  func.func @transform_1(%arg0: i32) -> (i32, i32, i32) {
    %c0_i32 = arith.constant 0 : i32
    %c0_i32_0 = arith.constant 0 : i32
    %c0_i32_1 = arith.constant 0 : i32
    %c0_i32_2 = arith.constant 0 : i32
    return %c0_i32, %c0_i32_0, %c0_i32_1 : i32, i32, i32
  }
  func.func @transform_2(%arg0: i32) -> (i32, i32, i32, i32) {
    %c0_i32 = arith.constant 0 : i32
    %c0_i32_0 = arith.constant 0 : i32
    %c0_i32_1 = arith.constant 0 : i32
    %c0_i32_2 = arith.constant 0 : i32
    return %arg0, %c0_i32, %c0_i32_0, %c0_i32_1 : i32, i32, i32, i32
  }
}

</mosaic_0001>

<bundles_post_ra>
// kernel: tpu_custom_call.1
= control target key start
LH: loop header
LB: loop body
LE: loop exit
PB: predicated region body
PF: predicated region fallthrough
CT: control target
= control target key end

     0   :  { %s4992_s11 = smov 124   ;;  %vm370_vm0 = vsmask.f32 3328  ;;  %vm371_vm1 = vsmask.f32 7440  ;;  %vm88_vm2 = vcmask 31744   ;;  %s6197_s0 = inlined_call_operand.vmem [shape: bf16[2,9,2,9,8], index: 0, kind: input, shape index: {}]   ;;  %s6198_s1 = inlined_call_operand.vmem [shape: bf16[16,4,128], index: 1, kind: input, shape index: {}]   ;;  %s6199_s2 = inlined_call_operand.hbm [shape: bf16[2,8,8,128], index: 2, kind: output, shape index: {}]  }
   0x1   :  { %v4918_v0 = vld [vmem:[%s6197_s0] ss:$16 sps:$4 sm:$0xff]   ;;  %v4022_v12 = vld [vmem:[%s6197_s0 + $0x14] sm:$0x1]  ;;  %v4024_v15 = vld [vmem:[%s6197_s0 + $0x24] sm:$0x1] }
   0x2   :  { %72 = vrot.lane.b32.xlu0 %v4918_v0, %s4992_s11  ;;  %v4919_v1 = vld [vmem:[%s6197_s0 + $0x40] ss:$16 sps:$4 sm:$0xff]   ;;  %v2257_v18 = vshll.u32 %v4022_v12, 16  ;;  %v2271_v21 = vshll.u32 %v4024_v15, 16  ;;  %v4026_v26 = vld [vmem:[%s6197_s0 + $0x34] sm:$0x1]  ;;  %vm5106_vm4 = vmor %vm370_vm0, %vm371_vm1 }
   0x3   :  { %v4920_v2 = vld [vmem:[%s6197_s0 + $0x20] ss:$16 sps:$4 sm:$0xff]   ;;  %76 = vrot.lane.b32.xlu1 %v4919_v1, %s4992_s11  ;;  %v4028_v32 = vld [vmem:[%s6197_s0 + $0x44] sm:$0x1]  ;;  %vm113_vm3 = vcmask 1041408   ;;  %v2285_v37 = vshll.u32 %v4026_v26, 16 }
   0x4   :  { %v4921_v3 = vld [vmem:[%s6197_s0 + $0x60] ss:$16 sps:$4 sm:$0xff]   ;;  %v2259_v28 = vrot.slane %v2257_v18, 5  ;;  %v2273_v31 = vrot.slane %v2271_v21, 5  ;;  %v2299_v43 = vshll.u32 %v4028_v32, 16 }
   0x5   :  { %v4922_v4 = vld [vmem:[%s6197_s0 + $0x90] ss:$16 sps:$4 sm:$0xff]   ;;  %v4030_v44 = vld [vmem:[%s6197_s0 + $0x54] sm:$0x1]  ;;  %v2287_v48 = vrot.slane %v2285_v37, 5 }
   0x6   :  { %74 = vrot.lane.b32.xlu0 %v4920_v2, %s4992_s11  ;;  %v4923_v5 = vld [vmem:[%s6197_s0 + $0xb0] ss:$16 sps:$4 sm:$0xff]   ;;  %v2301_v53 = vrot.slane %v2299_v43, 5  ;;  %v4032_v62 = vld [vmem:[%s6197_s0 + $0x64] sm:$0x1]  ;;  %v2313_v63 = vshll.u32 %v4030_v44, 16 }
   0x7   :  { %78 = vrot.lane.b32.xlu1 %v4921_v3, %s4992_s11  ;;  %v4924_v6 = vld [vmem:[%s6197_s0 + $0xd0] ss:$16 sps:$4 sm:$0xff]   ;;  %v4036_v18 = vld [vmem:[%s6197_s0 + $0x84] sm:$0x1] }
   0x8   :  { %v4925_v7 = vld [vmem:[%s6197_s0 + $0xf0] ss:$16 sps:$4 sm:$0xff]  }
   0x9   :  { %v4926_v8 = vld [vmem:[%s6197_s0 + $0x10] ss:$16 sps:$4 sm:$0xff]  }
   0xa   :  { %80 = vrot.lane.b32.xlu0 %v4922_v4, %s4992_s11  ;;  %v5048_v9 = vld [vmem:[%s6197_s0 + $0x30] ss:$16 sps:$4 sm:$0xff]   ;;  %4516 = vmatprep.mubr.msk.bf16.mxu0 %vm88_vm2, %v4926_v8 }
   0xb   :  { %82 = vrot.lane.b32.xlu1 %v4923_v5, %s4992_s11  ;;  %v5054_v10 = vld [vmem:[%s6197_s0 + $0x50] ss:$16 sps:$4 sm:$0xff]  }
   0xc   :  { %v4021_v11 = vld [vmem:[%s6197_s0 + $0x10] sm:$0xf]  ;;  %v4023_v14 = vld [vmem:[%s6197_s0 + $0x20] sm:$0xf] }
   0xd   :  { %v5066_v13 = vld [vmem:[%s6197_s0 + $0x70] ss:$16 sps:$4 sm:$0xff]   ;;  %v2248_v16 = vshrl.u32 %v4021_v11, 16  ;;  %v2251_v17 = vshll.u32 %v4021_v11, 16  ;;  %v2262_v19 = vshrl.u32 %v4023_v14, 16  ;;  %v2265_v20 = vshll.u32 %v4023_v14, 16 }
   0xe   :  { %84 = vrot.lane.b32.xlu0 %v4924_v6, %s4992_s11  ;;  %v4025_v22 = vld [vmem:[%s6197_s0 + $0x30] sm:$0xf]  ;;  %v4027_v27 = vld [vmem:[%s6197_s0 + $0x40] sm:$0xf]  ;;  %v4034_v6 = vld [vmem:[%s6197_s0 + $0x74] sm:$0x1] }
   0xf   :  { %86 = vrot.lane.b32.xlu1 %v4925_v7, %s4992_s11  ;;  %v5083_v23 = vld [vmem:[%s6197_s0 + $0xa0] ss:$16 sps:$4 sm:$0xff]   ;;  %v2250_v24 = vrot.slane %v2248_v16, 4  ;;  %v2253_v25 = vrot.slane %v2251_v17, 5  ;;  %v2264_v29 = vrot.slane %v2262_v19, 4  ;;  %v2267_v30 = vrot.slane %v2265_v20, 5 }
  0x10   :  { %v5099_v33 = vld [vmem:[%s6197_s0 + $0xc0] ss:$16 sps:$4 sm:$0xff]   ;;  %v2276_v35 = vshrl.u32 %v4025_v22, 16  ;;  %v2279_v36 = vshll.u32 %v4025_v22, 16  ;;  %v2290_v41 = vshrl.u32 %v4027_v27, 16  ;;  %v2293_v42 = vshll.u32 %v4027_v27, 16 }
  0x11   :  { %v2254_v34 = vor.u32 %v2253_v25, %v2250_v24  ;;  %v4029_v38 = vld [vmem:[%s6197_s0 + $0x50] sm:$0xf]  ;;  %v2268_v40 = vor.u32 %v2267_v30, %v2264_v29  ;;  %v4031_v49 = vld [vmem:[%s6197_s0 + $0x60] sm:$0xf]  ;;  %v2327_v17 = vshll.u32 %v4032_v62, 16  ;;  %v2341_v25 = vshll.u32 %v4034_v6, 16 }
  0x12   :  { %2059 = vrot.lane.b32.xlu0 %v4926_v8, %s4992_s11  ;;  %v2278_v46 = vrot.slane %v2276_v35, 4  ;;  %v2281_v47 = vrot.slane %v2279_v36, 5  ;;  %v2292_v51 = vrot.slane %v2290_v41, 4  ;;  %v2295_v52 = vrot.slane %v2293_v42, 5  ;;  %v5123_v54 = vld [vmem:[%s6197_s0 + $0xe0] ss:$16 sps:$4 sm:$0xff]  }
  0x13   :  { %2061 = vrot.lane.b32.xlu1 %v5048_v9, %s4992_s11  ;;  %v2255_v45 = vrot.slane %v2254_v34, 4  ;;  %v2269_v50 = vrot.slane %v2268_v40, 4  ;;  %v5128_v55 = vld [vmem:[%s6197_s0 + $0x100] ss:$16 sps:$4 sm:$0xff]   ;;  %v2304_v58 = vshrl.u32 %v4029_v38, 16  ;;  %v2307_v59 = vshll.u32 %v4029_v38, 16 }
  0x14   :  { %v2282_v57 = vor.u32 %v2281_v47, %v2278_v46  ;;  %v2296_v61 = vor.u32 %v2295_v52, %v2292_v51  ;;  %v2318_v0 = vshrl.u32 %v4031_v49, 16  ;;  %v4033_v1 = vld [vmem:[%s6197_s0 + $0x70] sm:$0xf]  ;;  %v2315_v8 = vrot.slane %v2313_v63, 5  ;;  %v4035_v14 = vld [vmem:[%s6197_s0 + $0x80] sm:$0xf] }
  0x15   :  { %v2260_v56 = vsel %vm5106_vm4, %v2255_v45, %v2259_v28  ;;  %v2274_v60 = vsel %vm5106_vm4, %v2269_v50, %v2273_v31  ;;  %v2306_v4 = vrot.slane %v2304_v58, 4  ;;  %v2309_v5 = vrot.slane %v2307_v59, 5  ;;  %v4037_v20 = vld [vmem:[%s6197_s0 + $0xa0] sm:$0xf]  ;;  %v5165_v26 = vld [vmem:[%s6198_s1 + $0x10] sm:$0x3] }
  0x16   :  { %2063 = vrot.lane.b32.xlu0 %v5054_v10, %s4992_s11  ;;  %v5142_v2 = vcombine.low %v2260_v56, %v2274_v60  ;;  %v2283_v3 = vrot.slane %v2282_v57, 4  ;;  %v2297_v7 = vrot.slane %v2296_v61, 4  ;;  %v2320_v11 = vrot.slane %v2318_v0, 4  ;;  %4906 = vmatprep.subr.msk.bf16.mxu0 %vm113_vm3, %v5165_v26  ;;  %v4038_v36 = vld [vmem:[%s6197_s0 + $0xa4] sm:$0x1] }
  0x17   :  { %2065 = vrot.lane.b32.xlu1 %v5066_v13, %s4992_s11  ;;  %v2321_v12 = vshll.u32 %v4031_v49, 16  ;;  %v2310_v16 = vor.u32 %v2309_v5, %v2306_v4  ;;  %v2332_v19 = vshrl.u32 %v4033_v1, 16  ;;  %v2335_v24 = vshll.u32 %v4033_v1, 16  ;;  %v4039_v41 = vld [vmem:[%s6197_s0 + $0xb0] sm:$0xf] }
  0x18   :  { %v2288_v15 = vsel %vm5106_vm4, %v2283_v3, %v2287_v48  ;;  %v2302_v21 = vsel %vm5106_vm4, %v2297_v7, %v2301_v53  ;;  %v2329_v29 = vrot.slane %v2327_v17, 5  ;;  %v2343_v34 = vrot.slane %v2341_v25, 5  ;;  %v4040_v49 = vld [vmem:[%s6197_s0 + $0xb4] sm:$0x1]  ;;  %v338_v58 = vld [vmem:[%s6197_s0] sm:$0xf] }
  0x19   :  { %v2323_v22 = vrot.slane %v2321_v12, 5  ;;  %v5169_v27 = vcombine.low %v2288_v15, %v2302_v21  ;;  %v2311_v28 = vrot.slane %v2310_v16, 4  ;;  %v2334_v30 = vrot.slane %v2332_v19, 4  ;;  %v339_v63 = vld [vmem:[%s6197_s0 + $0x4] sm:$0x1] }
  0x1a   :  { %2067 = vrot.lane.b32.xlu0 %v5083_v23, %s4992_s11  ;;  %v2337_v32 = vrot.slane %v2335_v24, 5  ;;  %v2346_v35 = vshrl.u32 %v4035_v14, 16  ;;  %v2349_v38 = vshll.u32 %v4035_v14, 16  ;;  %v2355_v40 = vshll.u32 %v4036_v18, 16  ;;  %v340_v0 = vld [vmem:[%s6197_s0 + $0x10] sm:$0xf] }
  0x1b   :  { %2069 = vrot.lane.b32.xlu1 %v5099_v33, %s4992_s11  ;;  %v2324_v31 = vor.u32 %v2323_v22, %v2320_v11  ;;  %v2316_v37 = vsel %vm5106_vm4, %v2311_v28, %v2315_v8  ;;  %v2360_v42 = vshrl.u32 %v4037_v20, 16  ;;  %v2363_v46 = vshll.u32 %v4037_v20, 16  ;;  %v341_v15 = vld [vmem:[%s6197_s0 + $0x14] sm:$0x1]  ;;  %v4041_v22 = vld [vmem:[%s6197_s0 + $0xc0] sm:$0xf] }
  0x1c   :  { %v2338_v44 = vor.u32 %v2337_v32, %v2334_v30  ;;  %v2348_v45 = vrot.slane %v2346_v35, 4  ;;  %v2351_v47 = vrot.slane %v2349_v38, 5  ;;  %v2357_v48 = vrot.slane %v2355_v40, 5  ;;  %v4042_v24 = vld [vmem:[%s6197_s0 + $0xc4] sm:$0x1] }
  0x1d   :  { %v2325_v43 = vrot.slane %v2324_v31, 4  ;;  %v2362_v50 = vrot.slane %v2360_v42, 4  ;;  %v2369_v51 = vshll.u32 %v4038_v36, 16  ;;  %v2365_v56 = vrot.slane %v2363_v46, 5  ;;  %v4043_v36 = vld [vmem:[%s6197_s0 + $0xd0] sm:$0xf] }
  0x1e   :  { %2071 = vrot.lane.b32.xlu0 %v5123_v54, %s4992_s11  ;;  %v2339_v53 = vrot.slane %v2338_v44, 4  ;;  %v2374_v57 = vshrl.u32 %v4039_v41, 16  ;;  %v2352_v60 = vor.u32 %v2351_v47, %v2348_v45  ;;  %v2377_v62 = vshll.u32 %v4039_v41, 16  ;;  %v4044_v38 = vld [vmem:[%s6197_s0 + $0xd4] sm:$0x1] }
  0x1f   :  { %2073 = vrot.lane.b32.xlu1 %v5128_v55, %s4992_s11  ;;  %v2330_v52 = vsel %vm5106_vm4, %v2325_v43, %v2329_v29  ;;  %v2371_v61 = vrot.slane %v2369_v51, 5  ;;  %v2366_v3 = vor.u32 %v2365_v56, %v2362_v50  ;;  %v2383_v5 = vshll.u32 %v4040_v49, 16  ;;  %v342_v47 = vld [vmem:[%s6197_s0 + $0x20] sm:$0xf]  ;;  %v343_v51 = vld [vmem:[%s6197_s0 + $0x24] sm:$0x1] }
  0x20   :  { %v5191_v59 = vcombine.low %v2316_v37, %v2330_v52  ;;  %v2344_v1 = vsel %vm5106_vm4, %v2339_v53, %v2343_v34  ;;  %v2376_v4 = vrot.slane %v2374_v57, 4  ;;  %v2353_v6 = vrot.slane %v2352_v60, 4 }
  0x21   :  { %v2379_v7 = vrot.slane %v2377_v62, 5  ;;  %v374_v8 = vshrl.u32 %v338_v58, 16  ;;  %v377_v11 = vshll.u32 %v338_v58, 16  ;;  %v2367_v12 = vrot.slane %v2366_v3, 4 }
  0x22   :  { %v2385_v14 = vrot.slane %v2383_v5, 5  ;;  %v383_v16 = vshll.u32 %v339_v63, 16  ;;  %v388_v17 = vshrl.u32 %v340_v0, 16  ;;  %v2358_v18 = vsel %vm5106_vm4, %v2353_v6, %v2357_v48 }
  0x23   :  { %2639 = vrot.lane.b32.xlu1 %v5142_v2, %s4992_s11  ;;  %v2380_v19 = vor.u32 %v2379_v7, %v2376_v4  ;;  %v376_v20 = vrot.slane %v374_v8, 4  ;;  %v379_v21 = vrot.slane %v377_v11, 5  ;;  %v5214_v25 = vcombine.low %v2344_v1, %v2358_v18  ;;  %v345_v4 = vld [vmem:[%s6197_s0 + $0x34] sm:$0x1]  ;;  %v4045_v11 = vld [vmem:[%s6197_s0 + $0xe0] sm:$0xf] }
  0x24   :  { %v2372_v28 = vsel %vm5106_vm4, %v2367_v12, %v2371_v61  ;;  %v385_v29 = vrot.slane %v383_v16, 5  ;;  %v390_v30 = vrot.slane %v388_v17, 4  ;;  %v391_v34 = vshll.u32 %v340_v0, 16  ;;  %v344_v61 = vld [vmem:[%s6197_s0 + $0x30] sm:$0xf] }
  0x25   :  { %v2381_v31 = vrot.slane %v2380_v19, 4  ;;  %v380_v32 = vor.u32 %v379_v21, %v376_v20  ;;  %v397_v35 = vshll.u32 %v341_v15, 16  ;;  %v1942_v37 = vsel %vm113_vm3, %v5165_v26, 0  ;;  %v4047_v21 = vld [vmem:[%s6197_s0 + $0xf0] sm:$0xf] }
  0x26   :  { %v2388_v40 = vshrl.u32 %v4041_v22, 16  ;;  %v2391_v41 = vshll.u32 %v4041_v22, 16  ;;  %v2397_v42 = vshll.u32 %v4042_v24, 16  ;;  %v393_v45 = vrot.slane %v391_v34, 5  ;;  %4515 = vmatpush3.bf16.msra.mxu0 %v1942_v37 }
  0x27   :  { %2641 = vrot.lane.b32.xlu1 %v5169_v27, %s4992_s11  ;;  %v2386_v43 = vsel %vm5106_vm4, %v2381_v31, %v2385_v14  ;;  %v381_v44 = vrot.slane %v380_v32, 4  ;;  %v399_v46 = vrot.slane %v397_v35, 5  ;;  %v2402_v56 = vshrl.u32 %v4043_v36, 16 }
  0x28   :  { %v5233_v48 = vcombine.low %v2372_v28, %v2386_v43  ;;  %v2390_v26 = vrot.slane %v2388_v40, 4  ;;  %v2393_v49 = vrot.slane %v2391_v41, 5  ;;  %v2399_v50 = vrot.slane %v2397_v42, 5  ;;  %v347_v42 = vld [vmem:[%s6197_s0 + $0x44] sm:$0x1] }
  0x29   :  { %v386_v52 = vsel %vm5106_vm4, %v381_v44, %v385_v29  ;;  %v394_v53 = vor.u32 %v393_v45, %v390_v30  ;;  %v2405_v57 = vshll.u32 %v4043_v36, 16  ;;  %v2411_v60 = vshll.u32 %v4044_v38, 16  ;;  %4517 = vmatmul.mubr.msk.bf16.vlgmr.msra.gmra.mrb[0].mxu0 %vm88_vm2, %v5048_v9  ;;  %v4048_v29 = vld [vmem:[%s6197_s0 + $0xf4] sm:$0x1]  ;;  %v346_v36 = vld [vmem:[%s6197_s0 + $0x40] sm:$0xf] }
  0x2a   :  { %v2394_v58 = vor.u32 %v2393_v49, %v2390_v26  ;;  %v402_v62 = vshrl.u32 %v342_v47, 16  ;;  %v405_v63 = vshll.u32 %v342_v47, 16  ;;  %v2404_v1 = vrot.slane %v2402_v56, 4  ;;  %4520 = vmatprep.mubr.msk.bf16.mxu0 %vm88_vm2, %v5054_v10  ;;  %v4046_v10 = vld [vmem:[%s6197_s0 + $0xe4] sm:$0x1] }
  0x2b   :  { %2643 = vrot.lane.b32.xlu1 %v5191_v59, %s4992_s11  ;;  %v395_v0 = vrot.slane %v394_v53, 4  ;;  %v2407_v3 = vrot.slane %v2405_v57, 5  ;;  %v411_v5 = vshll.u32 %v343_v51, 16  ;;  %v2413_v7 = vrot.slane %v2411_v60, 5  ;;  %v348_v47 = vld [vmem:[%s6197_s0 + $0x50] sm:$0xf] }
  0x2c   :  { %v2395_v6 = vrot.slane %v2394_v58, 4  ;;  %v404_v9 = vrot.slane %v402_v62, 4  ;;  %v407_v8 = vrot.slane %v405_v63, 5  ;;  %v416_v16 = vshrl.u32 %v344_v61, 16  ;;  %v5294_v26 = vld [vmem:[%s6198_s1 + $0x2] sm:$0x3] }
  0x2d   :  { %v400_v12 = vsel %vm5106_vm4, %v395_v0, %v399_v46  ;;  %v2408_v14 = vor.u32 %v2407_v3, %v2404_v1  ;;  %v413_v15 = vrot.slane %v411_v5, 5  ;;  %v419_v20 = vshll.u32 %v344_v61, 16  ;;  %4898 = vmatprep.subr.msk.bf16.mxu1 %vm113_vm3, %v5294_v26  ;;  %v349_v56 = vld [vmem:[%s6197_s0 + $0x54] sm:$0x1]  ;;  %v4049_v0 = vld [vmem:[%s6197_s0 + $0x100] sm:$0xf] }
  0x2e   :  { %v5262_v17 = vcombine.low %v386_v52, %v400_v12  ;;  %v2400_v18 = vsel %vm5106_vm4, %v2395_v6, %v2399_v50  ;;  %v408_v19 = vor.u32 %v407_v8, %v404_v9  ;;  %v418_v24 = vrot.slane %v416_v16, 4  ;;  %v4050_v5 = vld [vmem:[%s6197_s0 + $0x104] sm:$0x1]  ;;  %v5321_v12 = vld [vmem:[%s6198_s1 + $0x12] sm:$0x3] }
  0x2f   :  { %2645 = vrot.lane.b32.xlu1 %v5214_v25, %s4992_s11  ;;  %v2409_v22 = vrot.slane %v2408_v14, 4  ;;  %v425_v28 = vshll.u32 %v345_v4, 16  ;;  %v2416_v30 = vshrl.u32 %v4045_v11, 16  ;;  %v421_v32 = vrot.slane %v419_v20, 5  ;;  %4907 = vmatprep.subr.msk.bf16.mxu0 %vm113_vm3, %v5321_v12 }
  0x30   :  { %765 = vrot.lane.b32.xlu0 %v5262_v17, %s4992_s11  ;;  %v409_v31 = vrot.slane %v408_v19, 4  ;;  %v2419_v34 = vshll.u32 %v4045_v11, 16  ;;  %v2425_v35 = vshll.u32 %v4046_v10, 16  ;;  %v2430_v41 = vshrl.u32 %v4047_v21, 16  ;;  %v4051_v11 = vld [vmem:[%s6197_s0 + $0x110] sm:$0xf] }
  0x31   :  { %v2414_v37 = vsel %vm5106_vm4, %v2409_v22, %v2413_v7  ;;  %v427_v38 = vrot.slane %v425_v28, 5  ;;  %v2418_v40 = vrot.slane %v2416_v30, 4  ;;  %v422_v45 = vor.u32 %v421_v32, %v418_v24  ;;  %4521 = vmatmul.mubr.msk.bf16.gmra.mrb[4].mxu0 %vm88_vm2, %v5066_v13  ;;  %v350_v24 = vld [vmem:[%s6197_s0 + $0x60] sm:$0xf]  ;;  %v351_v32 = vld [vmem:[%s6197_s0 + $0x64] sm:$0x1] }
  0x32   :  { %v5282_v43 = vcombine.low %v2400_v18, %v2414_v37  ;;  %v414_v44 = vsel %vm5106_vm4, %v409_v31, %v413_v15  ;;  %v2421_v46 = vrot.slane %v2419_v34, 5  ;;  %v2427_v49 = vrot.slane %v2425_v35, 5  ;;  %4524 = vmatprep.mubr.msk.bf16.mxu0 %vm88_vm2, %v5083_v23  ;;  %v4052_v18 = vld [vmem:[%s6197_s0 + $0x114] sm:$0x1] }
  0x33   :  { %2647 = vrot.lane.b32.xlu1 %v5233_v48, %s4992_s11  ;;  %v2432_v50 = vrot.slane %v2430_v41, 4  ;;  %v2433_v51 = vshll.u32 %v4047_v21, 16  ;;  %v2439_v52 = vshll.u32 %v4048_v29, 16  ;;  %v423_v53 = vrot.slane %v422_v45, 4 }
  0x34   :  { %v2422_v13 = vor.u32 %v2421_v46, %v2418_v40  ;;  %v430_v57 = vshrl.u32 %v346_v36, 16  ;;  %v433_v58 = vshll.u32 %v346_v36, 16  ;;  %v439_v62 = vshll.u32 %v347_v42, 16 }
  0x35   :  { %v2435_v60 = vrot.slane %v2433_v51, 5  ;;  %v2441_v61 = vrot.slane %v2439_v52, 5  ;;  %v444_v63 = vshrl.u32 %v348_v47, 16  ;;  %v428_v23 = vsel %vm5106_vm4, %v423_v53, %v427_v38  ;;  %v352_v38 = vld [vmem:[%s6197_s0 + $0x70] sm:$0xf] }
  0x36   :  { %v2423_v1 = vrot.slane %v2422_v13, 4  ;;  %v432_v3 = vrot.slane %v430_v57, 4  ;;  %v435_v4 = vrot.slane %v433_v58, 5  ;;  %v5313_v6 = vcombine.low %v414_v44, %v428_v23  ;;  %v355_v13 = vld [vmem:[%s6197_s0 + $0x94] sm:$0x1] }
  0x37   :  { %2649 = vrot.lane.b32.xlu1 %v5282_v43, %s4992_s11  ;;  %v2436_v7 = vor.u32 %v2435_v60, %v2432_v50  ;;  %v441_v9 = vrot.slane %v439_v62, 5  ;;  %v446_v8 = vrot.slane %v444_v63, 4  ;;  %v447_v16 = vshll.u32 %v348_v47, 16  ;;  %v353_v47 = vld [vmem:[%s6197_s0 + $0x74] sm:$0x1] }
  0x38   :  { %v2428_v14 = vsel %vm5106_vm4, %v2423_v1, %v2427_v49  ;;  %v436_v15 = vor.u32 %v435_v4, %v432_v3  ;;  %v453_v10 = vshll.u32 %v349_v56, 16  ;;  %767 = vrot.lane.b32.xlu0 %v5313_v6, %s4992_s11  ;;  %v2444_v20 = vshrl.u32 %v4049_v0, 16  ;;  %v354_v50 = vld [vmem:[%s6197_s0 + $0x90] sm:$0xf] }
  0x39   :  { %v2437_v19 = vrot.slane %v2436_v7, 4  ;;  %v2447_v21 = vshll.u32 %v4049_v0, 16  ;;  %v2453_v22 = vshll.u32 %v4050_v5, 16  ;;  %v449_v29 = vrot.slane %v447_v16, 5  ;;  %4525 = vmatmul.mubr.msk.bf16.gmra.mrb[8].mxu0 %vm88_vm2, %v5099_v33 }
  0x3a   :  { %v437_v28 = vrot.slane %v436_v15, 4  ;;  %v455_v30 = vrot.slane %v453_v10, 5  ;;  %v2458_v31 = vshrl.u32 %v4051_v11, 16  ;;  %v2446_v35 = vrot.slane %v2444_v20, 4  ;;  %4528 = vmatprep.mubr.msk.bf16.mxu0 %vm88_vm2, %v5123_v54  ;;  %v358_v15 = vld [vmem:[%s6197_s0 + $0xb0] sm:$0xf] }
  0x3b   :  { %v2442_v34 = vsel %vm5106_vm4, %v2437_v19, %v2441_v61  ;;  %v2449_v36 = vrot.slane %v2447_v21, 5  ;;  %v2455_v37 = vrot.slane %v2453_v22, 5  ;;  %v450_v42 = vor.u32 %v449_v29, %v446_v8  ;;  %v356_v61 = vld [vmem:[%s6197_s0 + $0xa0] sm:$0xf]  ;;  %v357_v8 = vld [vmem:[%s6197_s0 + $0xa4] sm:$0x1] }
  0x3c   :  { %v5347_v40 = vcombine.low %v2428_v14, %v2442_v34  ;;  %v442_v41 = vsel %vm5106_vm4, %v437_v28, %v441_v9  ;;  %v2460_v33 = vrot.slane %v2458_v31, 4  ;;  %v2461_v45 = vshll.u32 %v4051_v11, 16  ;;  %v359_v28 = vld [vmem:[%s6197_s0 + $0xb4] sm:$0x1]  ;;  %v5392_v34 = vld [vmem:[%s6198_s1] sm:$0x3] }
  0x3d   :  { %v2450_v44 = vor.u32 %v2449_v36, %v2446_v35  ;;  %v2467_v46 = vshll.u32 %v4052_v18, 16  ;;  %v458_v49 = vshrl.u32 %v350_v24, 16  ;;  %v451_v54 = vrot.slane %v450_v42, 4 }
  0x3e   :  { %2651 = vrot.lane.b32.xlu1 %v5347_v40, %s4992_s11  ;;  %v461_v51 = vshll.u32 %v350_v24, 16  ;;  %v467_v52 = vshll.u32 %v351_v32, 16  ;;  %v472_v53 = vshrl.u32 %v352_v38, 16  ;;  %v2463_v57 = vrot.slane %v2461_v45, 5  ;;  %v360_v32 = vld [vmem:[%s6197_s0 + $0xc0] sm:$0xf] }
  0x3f   :  { %v2451_v56 = vrot.slane %v2450_v44, 4  ;;  %v2469_v58 = vrot.slane %v2467_v46, 5  ;;  %v460_v60 = vrot.slane %v458_v49, 4  ;;  %v456_v62 = vsel %vm5106_vm4, %v451_v54, %v455_v30  ;;  %v4934_v46 = vld [vmem:[%s6197_s0 + $0x18] ss:$16 sps:$4 sm:$0xff]  }
  0x40   :  { %v463_v63 = vrot.slane %v461_v51, 5  ;;  %v469_v0 = vrot.slane %v467_v52, 5  ;;  %v474_v23 = vrot.slane %v472_v53, 4  ;;  %v5367_v1 = vcombine.low %v442_v41, %v456_v62  ;;  %v361_v41 = vld [vmem:[%s6197_s0 + $0xc4] sm:$0x1] }
  0x41   :  { %v2456_v3 = vsel %vm5106_vm4, %v2451_v56, %v2455_v37  ;;  %v2464_v4 = vor.u32 %v2463_v57, %v2460_v33  ;;  %v475_v5 = vshll.u32 %v352_v38, 16  ;;  %v481_v9 = vshll.u32 %v353_v47, 16  ;;  %4529 = vmatmul.mubr.msk.bf16.gmra.mrb[12].mxu0 %vm88_vm2, %v5128_v55  ;;  %v362_v51 = vld [vmem:[%s6197_s0 + $0xd0] sm:$0xf]  ;;  %v364_v56 = vld [vmem:[%s6197_s0 + $0xe0] sm:$0xf] }
  0x42   :  { %v464_v7 = vor.u32 %v463_v63, %v460_v60  ;;  %v486_v11 = vshrl.u32 %v354_v50, 16  ;;  %v489_v14 = vshll.u32 %v354_v50, 16  ;;  %769 = vrot.lane.b32.xlu0 %v5367_v1, %s4992_s11  ;;  %v495_v18 = vshll.u32 %v355_v13, 16  ;;  %v363_v13 = vld [vmem:[%s6197_s0 + $0xd4] sm:$0x1] }
  0x43   :  { %v2465_v16 = vrot.slane %v2464_v4, 4  ;;  %v477_v10 = vrot.slane %v475_v5, 5  ;;  %v500_v19 = vshrl.u32 %v356_v61, 16  ;;  %v483_v21 = vrot.slane %v481_v9, 5  ;;  %v5426_v62 = vld [vmem:[%s6198_s1 + $0x14] sm:$0x3] }
  0x44   :  { %v465_v20 = vrot.slane %v464_v7, 4  ;;  %v488_v22 = vrot.slane %v486_v11, 4  ;;  %v491_v24 = vrot.slane %v489_v14, 5  ;;  %v497_v55 = vrot.slane %v495_v18, 5  ;;  %v366_v11 = vld [vmem:[%s6197_s0 + $0xf0] sm:$0xf] }
  0x45   :  { %v2470_v29 = vsel %vm5106_vm4, %v2465_v16, %v2469_v58  ;;  %v478_v30 = vor.u32 %v477_v10, %v474_v23  ;;  %v502_v31 = vrot.slane %v500_v19, 4  ;;  %v503_v38 = vshll.u32 %v356_v61, 16  ;;  %v4935_v14 = vld [vmem:[%s6197_s0 + $0x38] ss:$16 sps:$4 sm:$0xff]  }
  0x46   :  { %v5394_v35 = vcombine.low %v2456_v3, %v2470_v29  ;;  %v470_v36 = vsel %vm5106_vm4, %v465_v20, %v469_v0  ;;  %v492_v37 = vor.u32 %v491_v24, %v488_v22  ;;  %v509_v33 = vshll.u32 %v357_v8, 16  ;;  %v365_v8 = vld [vmem:[%s6197_s0 + $0xe4] sm:$0x1]  ;;  %v367_v22 = vld [vmem:[%s6197_s0 + $0xf4] sm:$0x1] }
  0x47   :  { %v479_v42 = vrot.slane %v478_v30, 4  ;;  %v115_v44 = vsel %vm113_vm3, %v5294_v26, 0  ;;  %v514_v45 = vshrl.u32 %v358_v15, 16  ;;  %v505_v49 = vrot.slane %v503_v38, 5 }
  0x48   :  { %2653 = vrot.lane.b32.xlu1 %v5394_v35, %s4992_s11  ;;  %v493_v47 = vrot.slane %v492_v37, 4  ;;  %4371 = vmatpush3.bf16.msra.mxu1 %v115_v44  ;;  %v517_v50 = vshll.u32 %v358_v15, 16  ;;  %v523_v54 = vshll.u32 %v359_v28, 16  ;;  %v528_v53 = vshrl.u32 %v360_v32, 16  ;;  %v4936_v37 = vld [vmem:[%s6197_s0 + $0x58] ss:$16 sps:$4 sm:$0xff]  }
  0x49   :  { %v484_v26 = vsel %vm5106_vm4, %v479_v42, %v483_v21  ;;  %v516_v52 = vrot.slane %v514_v45, 4  ;;  %4899 = vmatprep.subr.msk.bf16.mxu1 %vm113_vm3, %v5392_v34  ;;  %v506_v58 = vor.u32 %v505_v49, %v502_v31  ;;  %v511_v60 = vrot.slane %v509_v33, 5  ;;  %v369_v33 = vld [vmem:[%s6197_s0 + $0x104] sm:$0x1] }
  0x4a   :  { %v5421_v57 = vcombine.low %v470_v36, %v484_v26  ;;  %v519_v61 = vrot.slane %v517_v50, 5  ;;  %v498_v63 = vsel %vm5106_vm4, %v493_v47, %v497_v55  ;;  %v530_v0 = vrot.slane %v528_v53, 4  ;;  %v368_v55 = vld [vmem:[%s6197_s0 + $0x100] sm:$0xf] }
  0x4b   :  { %v531_v23 = vshll.u32 %v360_v32, 16  ;;  %v537_v3 = vshll.u32 %v361_v41, 16  ;;  %v507_v4 = vrot.slane %v506_v58, 4  ;;  %v525_v7 = vrot.slane %v523_v54, 5  ;;  %v4937_v58 = vld [vmem:[%s6197_s0 + $0x78] ss:$16 sps:$4 sm:$0xff]  }
  0x4c   :  { %771 = vrot.lane.b32.xlu0 %v5421_v57, %s4992_s11  ;;  %v520_v5 = vor.u32 %v519_v61, %v516_v52  ;;  %v2100_v9 = vsel %vm113_vm3, %v5321_v12, 0  ;;  %2996 = vrot.lane.b32.xlu1 %v4934_v46, %s4992_s11  ;;  %v542_v10 = vshrl.u32 %v362_v51, 16  ;;  %v545_v18 = vshll.u32 %v362_v51, 16 }
  0x4d   :  { %v533_v15 = vrot.slane %v531_v23, 5  ;;  %v539_v16 = vrot.slane %v537_v3, 5  ;;  %4533 = vmatpush3.bf16.msra.mxu0 %v2100_v9  ;;  %v512_v12 = vsel %vm5106_vm4, %v507_v4, %v511_v60  ;;  %v551_v20 = vshll.u32 %v363_v13, 16 }
  0x4e   :  { %v521_v19 = vrot.slane %v520_v5, 4  ;;  %v556_v21 = vshrl.u32 %v364_v56, 16  ;;  %4908 = vmatprep.subr.msk.bf16.mxu0 %vm113_vm3, %v5426_v62  ;;  %v5451_v24 = vcombine.low %v498_v63, %v512_v12  ;;  %v544_v29 = vrot.slane %v542_v10, 4  ;;  %v4940_v12 = vld [vmem:[%s6197_s0 + $0xc8] ss:$16 sps:$4 sm:$0xff]  }
  0x4f   :  { %v534_v28 = vor.u32 %v533_v15, %v530_v0  ;;  %v547_v30 = vrot.slane %v545_v18, 5  ;;  %v559_v36 = vshll.u32 %v364_v56, 16  ;;  %v565_v42 = vshll.u32 %v365_v8, 16  ;;  %v4938_v8 = vld [vmem:[%s6197_s0 + $0xa8] ss:$16 sps:$4 sm:$0xff]  }
  0x50   :  { %v526_v31 = vsel %vm5106_vm4, %v521_v19, %v525_v7  ;;  %v558_v32 = vrot.slane %v556_v21, 4  ;;  %2998 = vrot.lane.b32.xlu1 %v4935_v14, %s4992_s11  ;;  %773 = vrot.lane.b32.xlu0 %v5451_v24, %s4992_s11  ;;  %v570_v44 = vshrl.u32 %v366_v11, 16  ;;  %v553_v45 = vrot.slane %v551_v20, 5  ;;  %v5494_v18 = vld [vmem:[%s6198_s1 + $0x4] sm:$0x3] }
  0x51   :  { %v535_v38 = vrot.slane %v534_v28, 4  ;;  %v548_v41 = vor.u32 %v547_v30, %v544_v29  ;;  %v561_v46 = vrot.slane %v559_v36, 5  ;;  %v573_v47 = vshll.u32 %v366_v11, 16  ;;  %v4939_v28 = vld [vmem:[%s6197_s0 + $0x8] ss:$16 sps:$4 sm:$0xff]  }
  0x52   :  { %v584_v49 = vshrl.u32 %v368_v55, 16  ;;  %v572_v51 = vrot.slane %v570_v44, 4  ;;  %v579_v26 = vshll.u32 %v367_v22, 16  ;;  %v567_v13 = vrot.slane %v565_v42, 5  ;;  %v4942_v29 = vld [vmem:[%s6197_s0 + $0xe8] ss:$16 sps:$4 sm:$0xff]  }
  0x53   :  { %v540_v50 = vsel %vm5106_vm4, %v535_v38, %v539_v16  ;;  %v549_v54 = vrot.slane %v548_v41, 4  ;;  %v562_v53 = vor.u32 %v561_v46, %v558_v32  ;;  %v575_v56 = vrot.slane %v573_v47, 5  ;;  %v4121_v30 = vld [vmem:[%s6197_s0 + $0x18] sm:$0xf]  ;;  %v4126_v44 = vld [vmem:[%s6197_s0 + $0x3c] sm:$0x1] }
  0x54   :  { %v5469_v52 = vcombine.low %v526_v31, %v540_v50  ;;  %3000 = vrot.lane.b32.xlu1 %v4936_v37, %s4992_s11  ;;  %v586_v60 = vrot.slane %v584_v49, 4  ;;  %v587_v61 = vshll.u32 %v368_v55, 16  ;;  %v593_v63 = vshll.u32 %v369_v33, 16  ;;  %v4123_v55 = vld [vmem:[%s6197_s0 + $0x28] sm:$0xf] }
  0x55   :  { %v554_v0 = vsel %vm5106_vm4, %v549_v54, %v553_v45  ;;  %v563_v23 = vrot.slane %v562_v53, 4  ;;  %v576_v3 = vor.u32 %v575_v56, %v572_v51  ;;  %v581_v4 = vrot.slane %v579_v26, 5  ;;  %v4124_v31 = vld [vmem:[%s6197_s0 + $0x2c] sm:$0x1]  ;;  %v4125_v33 = vld [vmem:[%s6197_s0 + $0x38] sm:$0xf] }
  0x56   :  { %775 = vrot.lane.b32.xlu0 %v5469_v52, %s4992_s11  ;;  %v589_v5 = vrot.slane %v587_v61, 5  ;;  %v595_v15 = vrot.slane %v593_v63, 5  ;;  %v5504_v20 = vsel %vm113_vm3, %v5392_v34, 0  ;;  %v5510_v22 = vsel %vm113_vm3, %v5494_v18, 0  ;;  %v4122_v34 = vld [vmem:[%s6197_s0 + $0x1c] sm:$0x1] }
  0x57   :  { %v568_v7 = vsel %vm5106_vm4, %v563_v23, %v567_v13  ;;  %v577_v9 = vrot.slane %v576_v3, 4  ;;  %v3185_v32 = vshrl.u32 %v4121_v30, 16  ;;  %v3188_v36 = vshll.u32 %v4121_v30, 16  ;;  %v4941_v45 = vld [vmem:[%s6197_s0 + $0x28] ss:$16 sps:$4 sm:$0xff]  }
  0x58   :  { %3002 = vrot.lane.b32.xlu1 %v4937_v58, %s4992_s11  ;;  %v5485_v11 = vcombine.low %v554_v0, %v568_v7  ;;  %v590_v14 = vor.u32 %v589_v5, %v586_v60  ;;  %v3194_v37 = vshll.u32 %v4122_v34, 16  ;;  %v3199_v38 = vshrl.u32 %v4123_v55, 16  ;;  %v4944_v46 = vld [vmem:[%s6197_s0 + $0x108] ss:$16 sps:$4 sm:$0xff]   ;;  %v4128_v13 = vld [vmem:[%s6197_s0 + $0x4c] sm:$0x1] }
  0x59   :  { %v582_v16 = vsel %vm5106_vm4, %v577_v9, %v581_v4  ;;  %v3202_v41 = vshll.u32 %v4123_v55, 16  ;;  %v3208_v42 = vshll.u32 %v4124_v31, 16  ;;  %v3187_v47 = vrot.slane %v3185_v32, 4  ;;  %v4127_v51 = vld [vmem:[%s6197_s0 + $0x48] sm:$0xf] }
  0x5a   :  { %777 = vrot.lane.b32.xlu0 %v5485_v11, %s4992_s11  ;;  %v591_v10 = vrot.slane %v590_v14, 4  ;;  %v3190_v49 = vrot.slane %v3188_v36, 5  ;;  %v3196_v50 = vrot.slane %v3194_v37, 5  ;;  %v3201_v54 = vrot.slane %v3199_v38, 4  ;;  %v4129_v23 = vld [vmem:[%s6197_s0 + $0x58] sm:$0xf] }
  0x5b   :  { %v3204_v26 = vrot.slane %v3202_v41, 5  ;;  %v3210_v53 = vrot.slane %v3208_v42, 5  ;;  %v3213_v56 = vshrl.u32 %v4125_v33, 16  ;;  %v3216_v58 = vshll.u32 %v4125_v33, 16  ;;  %v4130_v9 = vld [vmem:[%s6197_s0 + $0x5c] sm:$0x1] }
  0x5c   :  { %3004 = vrot.lane.b32.xlu1 %v4938_v8, %s4992_s11  ;;  %v596_v19 = vsel %vm5106_vm4, %v591_v10, %v595_v15  ;;  %v3191_v60 = vor.u32 %v3190_v49, %v3187_v47  ;;  %v3222_v61 = vshll.u32 %v4126_v44, 16  ;;  %v3227_v63 = vshrl.u32 %v4127_v51, 16  ;;  %v4131_v10 = vld [vmem:[%s6197_s0 + $0x68] sm:$0xf]  ;;  %v4132_v31 = vld [vmem:[%s6197_s0 + $0x6c] sm:$0x1] }
  0x5d   :  { %v5506_v21 = vcombine.low %v582_v16, %v596_v19  ;;  %v3230_v0 = vshll.u32 %v4127_v51, 16  ;;  %v3205_v3 = vor.u32 %v3204_v26, %v3201_v54  ;;  %v3215_v4 = vrot.slane %v3213_v56, 4  ;;  %v5566_v30 = vld [vmem:[%s6197_s0 + $0x48] ss:$16 sps:$4 sm:$0xff]   ;;  %v4134_v47 = vld [vmem:[%s6197_s0 + $0x7c] sm:$0x1] }
  0x5e   :  { %v3218_v5 = vrot.slane %v3216_v58, 5  ;;  %v3236_v7 = vshll.u32 %v4128_v13, 16  ;;  %v3192_v8 = vrot.slane %v3191_v60, 4  ;;  %v3224_v14 = vrot.slane %v3222_v61, 5  ;;  %v4135_v26 = vld [vmem:[%s6197_s0 + $0x88] sm:$0xf] }
  0x5f   :  { %779 = vrot.lane.b32.xlu0 %v5506_v21, %s4992_s11  ;;  %v3229_v15 = vrot.slane %v3227_v63, 4  ;;  %v3232_v16 = vrot.slane %v3230_v0, 5  ;;  %v3244_v32 = vshll.u32 %v4129_v23, 16  ;;  %v3250_v36 = vshll.u32 %v4130_v9, 16  ;;  %v5598_v13 = vld [vmem:[%s6197_s0 + $0x68] ss:$16 sps:$4 sm:$0xff]  }
  0x60   :  { %3006 = vrot.lane.b32.xlu1 %v4940_v12, %s4992_s11  ;;  %v3206_v12 = vrot.slane %v3205_v3, 4  ;;  %v3219_v19 = vor.u32 %v3218_v5, %v3215_v4  ;;  %v3197_v34 = vsel %vm5106_vm4, %v3192_v8, %v3196_v50  ;;  %v3255_v42 = vshrl.u32 %v4131_v10, 16  ;;  %v4137_v4 = vld [vmem:[%s6197_s0 + $0xa8] sm:$0xf] }
  0x61   :  { %v3233_v55 = vor.u32 %v3232_v16, %v3229_v15  ;;  %v3258_v54 = vshll.u32 %v4131_v10, 16  ;;  %v3264_v51 = vshll.u32 %v4132_v31, 16  ;;  %v3252_v60 = vrot.slane %v3250_v36, 5 }
  0x62   :  { %v3211_v37 = vsel %vm5106_vm4, %v3206_v12, %v3210_v53  ;;  %v3220_v38 = vrot.slane %v3219_v19, 4  ;;  %v3257_v50 = vrot.slane %v3255_v42, 4  ;;  %v5591_v53 = vsel %vm113_vm3, %v5426_v62, 0  ;;  %v4136_v62 = vld [vmem:[%s6197_s0 + $0x8c] sm:$0x1] }
  0x63   :  { %1122 = vrot.lane.b32.xlu0 %v4939_v28, %s4992_s11  ;;  %v3238_v28 = vrot.slane %v3236_v7, 5  ;;  %v5576_v33 = vcombine.low %v3197_v34, %v3211_v37  ;;  %v3234_v44 = vrot.slane %v3233_v55, 4  ;;  %v3260_v0 = vrot.slane %v3258_v54, 5  ;;  %v5639_v54 = vld [vmem:[%s6197_s0 + $0xb8] ss:$16 sps:$4 sm:$0xff]  }
  0x64   :  { %3008 = vrot.lane.b32.xlu1 %v4942_v29, %s4992_s11  ;;  %v3241_v29 = vshrl.u32 %v4129_v23, 16  ;;  %v3225_v49 = vsel %vm5106_vm4, %v3220_v38, %v3224_v14  ;;  %v3266_v23 = vrot.slane %v3264_v51, 5  ;;  %v3278_v9 = vshll.u32 %v4134_v47, 16  ;;  %v4138_v14 = vld [vmem:[%s6197_s0 + $0xac] sm:$0x1] }
  0x65   :  { %v3239_v56 = vsel %vm5106_vm4, %v3234_v44, %v3238_v28  ;;  %v3283_v8 = vshrl.u32 %v4135_v26, 16  ;;  %v3261_v16 = vor.u32 %v3260_v0, %v3257_v50  ;;  %v3286_v12 = vshll.u32 %v4135_v26, 16  ;;  %v4139_v28 = vld [vmem:[%s6197_s0 + $0xb8] sm:$0xf] }
  0x66   :  { %v3243_v41 = vrot.slane %v3241_v29, 4  ;;  %v5607_v63 = vcombine.low %v3225_v49, %v3239_v56  ;;  %v3292_v19 = vshll.u32 %v4136_v62, 16  ;;  %v5624_v29 = vld [vmem:[%s6197_s0 + $0x98] ss:$16 sps:$4 sm:$0xff]   ;;  %v3280_v31 = vrot.slane %v3278_v9, 5 }
  0x67   :  { %1124 = vrot.lane.b32.xlu0 %v4941_v45, %s4992_s11  ;;  %v3246_v45 = vrot.slane %v3244_v32, 5  ;;  %v3285_v32 = vrot.slane %v3283_v8, 4  ;;  %v3262_v37 = vrot.slane %v3261_v16, 4  ;;  %v3288_v38 = vrot.slane %v3286_v12, 5 }
  0x68   :  { %3010 = vrot.lane.b32.xlu1 %v4944_v46, %s4992_s11  ;;  %v4133_v46 = vld [vmem:[%s6197_s0 + $0x78] sm:$0xf]  ;;  %v3297_v42 = vshrl.u32 %v4137_v4, 16  ;;  %v3306_v47 = vshll.u32 %v4138_v14, 16  ;;  %v3311_v49 = vshrl.u32 %v4139_v28, 16 }
  0x69   :  { %v3247_v58 = vor.u32 %v3246_v45, %v3243_v41  ;;  %v3269_v3 = vshrl.u32 %v4133_v46, 16  ;;  %v3272_v7 = vshll.u32 %v4133_v46, 16  ;;  %v3294_v41 = vrot.slane %v3292_v19, 5  ;;  %v4140_v45 = vld [vmem:[%s6197_s0 + $0xbc] sm:$0x1] }
  0x6a   :  { %v3300_v46 = vshll.u32 %v4137_v4, 16  ;;  %v3267_v51 = vsel %vm5106_vm4, %v3262_v37, %v3266_v23  ;;  %v3289_v26 = vor.u32 %v3288_v38, %v3285_v32  ;;  %v3299_v56 = vrot.slane %v3297_v42, 4  ;;  %v3922_v23 = vld [vmem:[%s6197_s0 + $0xc] sm:$0x1]  ;;  %v3923_v14 = vld [vmem:[%s6197_s0 + $0x18] sm:$0xf] }
  0x6b   :  { %1126 = vrot.lane.b32.xlu0 %v5566_v30, %s4992_s11  ;;  %v3248_v5 = vrot.slane %v3247_v58, 4  ;;  %v3271_v10 = vrot.slane %v3269_v3, 4  ;;  %v3274_v55 = vrot.slane %v3272_v7, 5  ;;  %v3314_v58 = vshll.u32 %v4139_v28, 16  ;;  %v5677_v32 = vld [vmem:[%s6197_s0 + $0xd8] ss:$16 sps:$4 sm:$0xff]  }
  0x6c   :  { %3576 = vrot.lane.b32.xlu1 %v5576_v33, %s4992_s11  ;;  %v3308_v0 = vrot.slane %v3306_v47, 5  ;;  %v3290_v4 = vrot.slane %v3289_v26, 4  ;;  %v3320_v9 = vshll.u32 %v4140_v45, 16  ;;  %v1328_v47 = vshll.u32 %v3923_v14, 16 }
  0x6d   :  { %v3253_v34 = vsel %vm5106_vm4, %v3248_v5, %v3252_v60  ;;  %v3275_v44 = vor.u32 %v3274_v55, %v3271_v10  ;;  %v3921_v60 = vld [vmem:[%s6197_s0 + $0x8] sm:$0xf]  ;;  %v3313_v5 = vrot.slane %v3311_v49, 4  ;;  %v3316_v7 = vrot.slane %v3314_v58, 5  ;;  %v4142_v49 = vld [vmem:[%s6197_s0 + $0xcc] sm:$0x1] }
  0x6e   :  { %v1314_v16 = vshll.u32 %v3921_v60, 16  ;;  %v3295_v12 = vsel %vm5106_vm4, %v3290_v4, %v3294_v41  ;;  %v3322_v28 = vrot.slane %v3320_v9, 5  ;;  %v1320_v55 = vshll.u32 %v3922_v23, 16  ;;  %v4143_v58 = vld [vmem:[%s6197_s0 + $0xd8] sm:$0xf] }
  0x6f   :  { %1128 = vrot.lane.b32.xlu0 %v5598_v13, %s4992_s11  ;;  %v3276_v62 = vrot.slane %v3275_v44, 4  ;;  %v3317_v19 = vor.u32 %v3316_v7, %v3313_v5  ;;  %v3925_v5 = vld [vmem:[%s6197_s0 + $0x28] sm:$0xf] }
  0x70   :  { %3578 = vrot.lane.b32.xlu1 %v5607_v63, %s4992_s11  ;;  %v1316_v41 = vrot.slane %v1314_v16, 5  ;;  %v1322_v45 = vrot.slane %v1320_v55, 5  ;;  %v5710_v7 = vld [vmem:[%s6197_s0 + $0xf8] ss:$16 sps:$4 sm:$0xff]   ;;  %v3342_v55 = vshll.u32 %v4143_v58, 16 }
  0x71   :  { %v3318_v44 = vrot.slane %v3317_v19, 4  ;;  %v3339_v19 = vshrl.u32 %v4143_v58, 16 }
  0x73   :  { %1130 = vrot.lane.b32.xlu0 %v5624_v29, %s4992_s11 }
  0x74   :  { %v73_v61 = vpop.permute.xlu0 %72 }
  0x75   :  { %4372 = vmatprep.mubr.msk.bf16.mxu1 %vm88_vm2, %v73_v61  ;;  %v77_v15 = vpop.permute.xlu1 %76  ;;  %v3302_v61 = vrot.slane %v3300_v46, 5  ;;  %v1325_v46 = vshrl.u32 %v3923_v14, 16 }
  0x77   :  { %v3303_v8 = vor.u32 %v3302_v61, %v3299_v56  ;;  %1132 = vrot.lane.b32.xlu0 %v5639_v54, %s4992_s11  ;;  %v1327_v23 = vrot.slane %v1325_v46, 4 }
  0x78   :  { %v75_v36 = vpop.permute.xlu0 %74 }
  0x79   :  { %4373 = vmatmul.mubr.msk.bf16.vlgmr.msra.gmra.mrb[0].mxu1 %vm88_vm2, %v75_v36  ;;  %v79_v50 = vpop.permute.xlu1 %78  ;;  %v3304_v37 = vrot.slane %v3303_v8, 4 }
  0x7a   :  { %4389 = vmatpush3.bf16.msra.mxu1 %v5504_v20  ;;  %4376 = vmatprep.mubr.msk.bf16.mxu1 %vm88_vm2, %v77_v15  ;;  %v5650_v20 = vcombine.low %v3253_v34, %v3267_v51  ;;  %v1311_v15 = vshrl.u32 %v3921_v60, 16  ;;  %v3924_v34 = vld [vmem:[%s6197_s0 + $0x1c] sm:$0x1] }
  0x7b   :  { %4900 = vmatprep.subr.msk.bf16.mxu1 %vm113_vm3, %v5494_v18  ;;  %v3281_v18 = vsel %vm5106_vm4, %v3276_v62, %v3280_v31  ;;  %v4141_v31 = vld [vmem:[%s6197_s0 + $0xc8] sm:$0xf]  ;;  %v3309_v51 = vsel %vm5106_vm4, %v3304_v37, %v3308_v0  ;;  %v1334_v56 = vshll.u32 %v3924_v34, 16  ;;  %v4144_v60 = vld [vmem:[%s6197_s0 + $0xdc] sm:$0x1]  ;;  %v1330_v0 = vrot.slane %v1328_v47, 5  ;;  %1134 = vrot.lane.b32.xlu0 %v5677_v32, %s4992_s11 }
  0x7c   :  { %v81_v3 = vpop.permute.xlu0 %80  ;;  %3580 = vrot.lane.b32.xlu1 %v5650_v20, %s4992_s11  ;;  %v5679_v36 = vcombine.low %v3281_v18, %v3295_v12  ;;  %v1313_v38 = vrot.slane %v1311_v15, 4  ;;  %v3325_v62 = vshrl.u32 %v4141_v31, 16  ;;  %v3328_v4 = vshll.u32 %v4141_v31, 16  ;;  %v3927_v37 = vld [vmem:[%s6197_s0 + $0x38] sm:$0xf] }
  0x7d   :  { %v5662_v10 = vpop.permute.xlu1 %82  ;;  %v1336_v18 = vrot.slane %v1334_v56, 5  ;;  %v1331_v15 = vor.u32 %v1330_v0, %v1327_v23  ;;  %v3334_v12 = vshll.u32 %v4142_v49, 16  ;;  %v3348_v31 = vshll.u32 %v4144_v60, 16  ;;  %v3928_v56 = vld [vmem:[%s6197_s0 + $0x3c] sm:$0x1] }
  0x7e   :  { %v1317_v26 = vor.u32 %v1316_v41, %v1313_v38  ;;  %v3327_v8 = vrot.slane %v3325_v62, 4  ;;  %v3330_v16 = vrot.slane %v3328_v4, 5  ;;  %v1339_v38 = vshrl.u32 %v3925_v5, 16 }
  0x7f   :  { %v1332_v46 = vrot.slane %v1331_v15, 4  ;;  %v3336_v49 = vrot.slane %v3334_v12, 5  ;;  %1136 = vrot.lane.b32.xlu0 %v5710_v7, %s4992_s11  ;;  %v1342_v60 = vshll.u32 %v3925_v5, 16  ;;  %v1353_v4 = vshrl.u32 %v3927_v37, 16  ;;  %v4147_v15 = vld [vmem:[%s6197_s0 + $0xf8] sm:$0xf] }
  0x80   :  { %v5681_v42 = vpop.permute.xlu0 %84  ;;  %3582 = vrot.lane.b32.xlu1 %v5679_v36, %s4992_s11  ;;  %v3331_v47 = vor.u32 %v3330_v16, %v3327_v8  ;;  %v1341_v58 = vrot.slane %v1339_v38, 4 }
  0x81   :  { %4377 = vmatmul.mubr.msk.bf16.gmra.mrb[4].mxu1 %vm88_vm2, %v79_v50  ;;  %v5697_v61 = vpop.permute.xlu1 %86  ;;  %v3323_v50 = vsel %vm5106_vm4, %v3318_v44, %v3322_v28  ;;  %v3926_v28 = vld [vmem:[%s6197_s0 + $0x2c] sm:$0x1]  ;;  %v5728_v44 = vld [vmem:[%s6198_s1 + $0x16] sm:$0x3]  ;;  %v1355_v12 = vrot.slane %v1353_v4, 4 }
  0x82   :  { %4380 = vmatprep.mubr.msk.bf16.mxu1 %vm88_vm2, %v81_v3  ;;  %v5712_v9 = vcombine.low %v3309_v51, %v3323_v50  ;;  %v1318_v3 = vrot.slane %v1317_v26, 4  ;;  %v3341_v51 = vrot.slane %v3339_v19, 4  ;;  %v3350_v26 = vrot.slane %v3348_v31, 5 }
  0x83   :  { %v1337_v50 = vsel %vm5106_vm4, %v1332_v46, %v1336_v18  ;;  %v3332_v23 = vrot.slane %v3331_v47, 4  ;;  %v1348_v0 = vshll.u32 %v3926_v28, 16  ;;  %v4146_v18 = vld [vmem:[%s6197_s0 + $0xec] sm:$0x1]  ;;  %v1362_v19 = vshll.u32 %v3928_v56, 16 }
  0x84   :  { %v2060_v14 = vpop.permute.xlu0 %2059  ;;  %3584 = vrot.lane.b32.xlu1 %v5712_v9, %s4992_s11  ;;  %v1323_v34 = vsel %vm5106_vm4, %v1318_v3, %v1322_v45  ;;  %v3344_v45 = vrot.slane %v3342_v55, 5  ;;  %v4145_v3 = vld [vmem:[%s6197_s0 + $0xe8] sm:$0xf]  ;;  %v3362_v46 = vshll.u32 %v4146_v18, 16  ;;  %v3367_v47 = vshrl.u32 %v4147_v15, 16 }
  0x85   :  { %4534 = vmatprep.mubr.msk.bf16.mxu0 %vm88_vm2, %v2060_v14  ;;  %v2062_v41 = vpop.permute.xlu1 %2061  ;;  %v5745_v8 = vcombine.low %v1323_v34, %v1337_v50  ;;  %v1344_v14 = vrot.slane %v1342_v60, 5  ;;  %v1350_v16 = vrot.slane %v1348_v0, 5  ;;  %v3353_v31 = vshrl.u32 %v4145_v3, 16 }
  0x86   :  { %4535 = vmatmul.mubr.msk.bf16.vlgmr.msra.gmra.mrb[0].mxu0 %vm88_vm2, %v2062_v41  ;;  %v3345_v5 = vor.u32 %v3344_v45, %v3341_v51  ;;  %v1364_v38 = vrot.slane %v1362_v19, 5  ;;  %v3356_v41 = vshll.u32 %v4145_v3, 16  ;;  %v3364_v0 = vrot.slane %v3362_v46, 5 }
  0x87   :  { %4551 = vmatpush3.bf16.msra.mxu0 %v5591_v53  ;;  %v1356_v53 = vshll.u32 %v3927_v37, 16  ;;  %1702 = vrot.lane.b32.xlu0 %v5745_v8, %s4992_s11  ;;  %v1345_v34 = vor.u32 %v1344_v14, %v1341_v58  ;;  %v3355_v60 = vrot.slane %v3353_v31, 4  ;;  %v3929_v58 = vld [vmem:[%s6197_s0 + $0x48] sm:$0xf]  ;;  %v3369_v4 = vrot.slane %v3367_v47, 4 }
  0x88   :  { %v2064_v62 = vpop.permute.xlu0 %2063  ;;  %4909 = vmatprep.subr.msk.bf16.mxu0 %vm113_vm3, %v5728_v44  ;;  %v3346_v28 = vrot.slane %v3345_v5, 4  ;;  %v3370_v14 = vshll.u32 %v4147_v15, 16  ;;  %v1370_v19 = vshll.u32 %v3929_v58, 16  ;;  %v4149_v31 = vld [vmem:[%s6197_s0 + $0x108] sm:$0xf] }
  0x89   :  { %4381 = vmatmul.mubr.msk.bf16.gmra.mrb[8].mxu1 %vm88_vm2, %v5662_v10  ;;  %4538 = vmatprep.mubr.msk.bf16.mxu0 %vm88_vm2, %v2064_v62  ;;  %v3337_v10 = vsel %vm5106_vm4, %v3332_v23, %v3336_v49  ;;  %v1358_v55 = vrot.slane %v1356_v53, 5  ;;  %v2066_v37 = vpop.permute.xlu1 %2065  ;;  %v1346_v45 = vrot.slane %v1345_v34, 4  ;;  %v3930_v62 = vld [vmem:[%s6197_s0 + $0x4c] sm:$0x1]  ;;  %v3358_v23 = vrot.slane %v3356_v41, 5 }
  0x8a   :  { %4384 = vmatprep.mubr.msk.bf16.mxu1 %vm88_vm2, %v5681_v42  ;;  %v4148_v42 = vld [vmem:[%s6197_s0 + $0xfc] sm:$0x1]  ;;  %v3351_v51 = vsel %vm5106_vm4, %v3346_v28, %v3350_v26  ;;  %v3931_v26 = vld [vmem:[%s6197_s0 + $0x58] sm:$0xf]  ;;  %v1376_v28 = vshll.u32 %v3930_v62, 16  ;;  %v1372_v46 = vrot.slane %v1370_v19, 5 }
  0x8b   :  { %v1359_v56 = vor.u32 %v1358_v55, %v1355_v12  ;;  %v5772_v50 = vcombine.low %v3337_v10, %v3351_v51  ;;  %v1351_v3 = vsel %vm5106_vm4, %v1346_v45, %v1350_v16  ;;  %v3376_v53 = vshll.u32 %v4148_v42, 16  ;;  %v3932_v10 = vld [vmem:[%s6197_s0 + $0x5c] sm:$0x1] }
  0x8c   :  { %v2068_v49 = vpop.permute.xlu0 %2067  ;;  %v3359_v18 = vor.u32 %v3358_v23, %v3355_v60  ;;  %v1367_v12 = vshrl.u32 %v3929_v58, 16  ;;  %v3372_v16 = vrot.slane %v3370_v14, 5  ;;  %v1381_v55 = vshrl.u32 %v3931_v26, 16 }
  0x8d   :  { %v1360_v5 = vrot.slane %v1359_v56, 4  ;;  %3586 = vrot.lane.b32.xlu1 %v5772_v50, %s4992_s11  ;;  %v3378_v34 = vrot.slane %v3376_v53, 5  ;;  %v1384_v45 = vshll.u32 %v3931_v26, 16  ;;  %v4151_v56 = vld [vmem:[%s6197_s0 + $0x118] sm:$0xf]  ;;  %v2070_v60 = vpop.permute.xlu1 %2069  ;;  %v1390_v23 = vshll.u32 %v3932_v10, 16 }
  0x8e   :  { %4539 = vmatmul.mubr.msk.bf16.gmra.mrb[4].mxu0 %vm88_vm2, %v2066_v37  ;;  %v4950_v37 = vld [vmem:[%s6197_s0] ss:$16 sps:$4 sm:$0xff]   ;;  %v3360_v41 = vrot.slane %v3359_v18, 4  ;;  %v3373_v47 = vor.u32 %v3372_v16, %v3369_v4  ;;  %v1383_v51 = vrot.slane %v1381_v55, 4  ;;  %v4152_v26 = vld [vmem:[%s6197_s0 + $0x11c] sm:$0x1] }
  0x8f   :  { %4542 = vmatprep.mubr.msk.bf16.mxu0 %vm88_vm2, %v2068_v49  ;;  %v1365_v15 = vsel %vm5106_vm4, %v1360_v5, %v1364_v38  ;;  %v4150_v38 = vld [vmem:[%s6197_s0 + $0x10c] sm:$0x1]  ;;  %v1378_v49 = vrot.slane %v1376_v28, 5  ;;  %v1386_v4 = vrot.slane %v1384_v45, 5  ;;  %v3384_v53 = vshll.u32 %v4149_v31, 16 }
  0x90   :  { %v5797_v42 = vcombine.low %v1351_v3, %v1365_v15  ;;  %v3365_v58 = vsel %vm5106_vm4, %v3360_v41, %v3364_v0  ;;  %v3381_v3 = vshrl.u32 %v4149_v31, 16  ;;  %v2072_v5 = vpop.permute.xlu0 %2071  ;;  %v3374_v14 = vrot.slane %v3373_v47, 4  ;;  %v3933_v0 = vld [vmem:[%s6197_s0 + $0x68] sm:$0xf]  ;;  %v3935_v31 = vld [vmem:[%s6197_s0 + $0x78] sm:$0xf] }
  0x91   :  { %4385 = vmatmul.mubr.msk.bf16.gmra.mrb[12].mxu1 %vm88_vm2, %v5697_v61  ;;  %v1369_v61 = vrot.slane %v1367_v12, 4  ;;  %v3390_v18 = vshll.u32 %v4150_v38, 16  ;;  %v1392_v19 = vrot.slane %v1390_v23, 5  ;;  %v3395_v15 = vshrl.u32 %v4151_v56, 16  ;;  %v5825_v41 = vld [vmem:[%s6198_s1 + $0x6] sm:$0x3] }
  0x92   :  { %4390 = vmatprep.mubr.msk.bf16.mxu1 %vm88_vm2, %v4950_v37  ;;  %1704 = vrot.lane.b32.xlu0 %v5797_v42, %s4992_s11  ;;  %v3383_v28 = vrot.slane %v3381_v3, 4  ;;  %v3379_v10 = vsel %vm5106_vm4, %v3374_v14, %v3378_v34  ;;  %v1387_v16 = vor.u32 %v1386_v4, %v1383_v51  ;;  %v3386_v55 = vrot.slane %v3384_v53, 5  ;;  %v3934_v47 = vld [vmem:[%s6197_s0 + $0x6c] sm:$0x1]  ;;  %v4951_v51 = vld [vmem:[%s6197_s0 + $0x20] ss:$16 sps:$4 sm:$0xff]  }
  0x93   :  { %v1373_v62 = vor.u32 %v1372_v46, %v1369_v61  ;;  %v3392_v37 = vrot.slane %v3390_v18, 5  ;;  %v5827_v61 = vcombine.low %v3365_v58, %v3379_v10  ;;  %v3397_v34 = vrot.slane %v3395_v15, 4  ;;  %v3936_v23 = vld [vmem:[%s6197_s0 + $0x7c] sm:$0x1]  ;;  %v3937_v53 = vld [vmem:[%s6197_s0 + $0x98] sm:$0xf]  ;;  %v2074_v18 = vpop.permute.xlu1 %2073 }
  0x94   :  { %v3398_v38 = vshll.u32 %v4151_v56, 16  ;;  %v1388_v45 = vrot.slane %v1387_v16, 4  ;;  %v1395_v58 = vshrl.u32 %v3933_v0, 16  ;;  %v1398_v3 = vshll.u32 %v3933_v0, 16  ;;  %v3938_v10 = vld [vmem:[%s6197_s0 + $0x9c] sm:$0x1] }
  0x95   :  { %v1374_v12 = vrot.slane %v1373_v62, 4  ;;  %v3404_v62 = vshll.u32 %v4152_v26, 16  ;;  %3588 = vrot.lane.b32.xlu1 %v5827_v61, %s4992_s11  ;;  %v1404_v26 = vshll.u32 %v3934_v47, 16  ;;  %v1418_v47 = vshll.u32 %v3936_v23, 16 }
  0x96   :  { %4543 = vmatmul.mubr.msk.bf16.gmra.mrb[8].mxu0 %vm88_vm2, %v2070_v60  ;;  %v3387_v60 = vor.u32 %v3386_v55, %v3383_v28  ;;  %v3400_v56 = vrot.slane %v3398_v38, 5  ;;  %v1397_v4 = vrot.slane %v1395_v58, 4  ;;  %v1400_v0 = vrot.slane %v1398_v3, 5 }
  0x97   :  { %4546 = vmatprep.mubr.msk.bf16.mxu0 %vm88_vm2, %v2072_v5  ;;  %v1379_v46 = vsel %vm5106_vm4, %v1374_v12, %v1378_v49  ;;  %v4952_v49 = vld [vmem:[%s6197_s0 + $0x40] ss:$16 sps:$4 sm:$0xff]   ;;  %v1409_v5 = vshrl.u32 %v3935_v31, 16  ;;  %v3406_v15 = vrot.slane %v3404_v62, 5  ;;  %v1412_v38 = vshll.u32 %v3935_v31, 16 }
  0x98   :  { %v3388_v14 = vrot.slane %v3387_v60, 4  ;;  %v3401_v28 = vor.u32 %v3400_v56, %v3397_v34 }
  0x99   :  { %4391 = vmatmul.mubr.msk.bf16.vlgmr.msra.gmra.mrb[0].mxu1 %vm88_vm2, %v4951_v51  ;;  %v1411_v55 = vrot.slane %v1409_v5, 4 }
  0x9a   :  { %4407 = vmatpush3.bf16.msra.mxu1 %v5510_v22  ;;  %4394 = vmatprep.mubr.msk.bf16.mxu1 %vm88_vm2, %v4952_v49  ;;  %v1393_v22 = vsel %vm5106_vm4, %v1388_v45, %v1392_v19  ;;  %v3939_v19 = vld [vmem:[%s6197_s0 + $0xa8] sm:$0xf]  ;;  %v3393_v16 = vsel %vm5106_vm4, %v3388_v14, %v3392_v37 }
  0x9b   :  { %4901 = vmatprep.subr.msk.bf16.mxu1 %vm113_vm3, %v5825_v41  ;;  %v5855_v12 = vcombine.low %v1379_v46, %v1393_v22 }
  0x9c   :  { %7 = vsyncpa [#allocation3], 0  ;;  %v3402_v46 = vrot.slane %v3401_v28, 4  ;;  %v1401_v34 = vor.u32 %v1400_v0, %v1397_v4  ;;  %v1423_v51 = vshrl.u32 %v3937_v53, 16  ;;  %v1426_v45 = vshll.u32 %v3937_v53, 16 }
  0x9d   :  { %1706 = vrot.lane.b32.xlu0 %v5855_v12, %s4992_s11  ;;  %v1406_v60 = vrot.slane %v1404_v26, 5  ;;  %v1414_v62 = vrot.slane %v1412_v38, 5  ;;  %v3940_v58 = vld [vmem:[%s6197_s0 + $0xac] sm:$0x1]  ;;  %v1432_v37 = vshll.u32 %v3938_v10, 16  ;;  %v1437_v49 = vshrl.u32 %v3939_v19, 16 }
  0x9e   :  { %4547 = vmatmul.mubr.msk.bf16.gmra.mrb[12].mxu0 %vm88_vm2, %v2074_v18  ;;  %v3407_v31 = vsel %vm5106_vm4, %v3402_v46, %v3406_v15  ;;  %v1402_v56 = vrot.slane %v1401_v34, 4  ;;  %v1425_v23 = vrot.slane %v1423_v51, 4  ;;  %v1428_v3 = vrot.slane %v1426_v45, 5  ;;  %v3941_v5 = vld [vmem:[%s6197_s0 + $0xb8] sm:$0xf] }
  0x9f   :  { %4552 = vmatprep.mubr.msk.bf16.mxu0 %vm88_vm2, %v5142_v2  ;;  %v4953_v22 = vld [vmem:[%s6197_s0 + $0x60] ss:$16 sps:$4 sm:$0xff]   ;;  %v2680_v14 = vsel %vm113_vm3, %v5728_v44, 0  ;;  %v5884_v2 = vcombine.low %v3393_v16, %v3407_v31  ;;  %v1415_v4 = vor.u32 %v1414_v62, %v1411_v55  ;;  %v1420_v26 = vrot.slane %v1418_v47, 5  ;;  %v3943_v53 = vld [vmem:[%s6197_s0 + $0xc8] sm:$0xf] }
  0xa0   :  { %v4954_v18 = vld [vmem:[%s6197_s0 + $0x90] ss:$16 sps:$4 sm:$0xff]   ;;  %v1429_v28 = vor.u32 %v1428_v3, %v1425_v23  ;;  %v1439_v15 = vrot.slane %v1437_v49, 4  ;;  %v1440_v0 = vshll.u32 %v3939_v19, 16  ;;  %v1446_v10 = vshll.u32 %v3940_v58, 16 }
  0xa1   :  { %4395 = vmatmul.mubr.msk.bf16.gmra.mrb[4].mxu1 %vm88_vm2, %v4953_v22  ;;  %v3942_v44 = vld [vmem:[%s6197_s0 + $0xbc] sm:$0x1]  ;;  %3590 = vrot.lane.b32.xlu1 %v5884_v2, %s4992_s11  ;;  %v1407_v16 = vsel %vm5106_vm4, %v1402_v56, %v1406_v60  ;;  %v1416_v55 = vrot.slane %v1415_v4, 4  ;;  %v1451_v38 = vshrl.u32 %v3941_v5, 16  ;;  %v1454_v47 = vshll.u32 %v3941_v5, 16 }
  0xa2   :  { %4398 = vmatprep.mubr.msk.bf16.mxu1 %vm88_vm2, %v4954_v18  ;;  %v1430_v46 = vrot.slane %v1429_v28, 4  ;;  %v1434_v34 = vrot.slane %v1432_v37, 5  ;;  %v1442_v51 = vrot.slane %v1440_v0, 5  ;;  %v3944_v19 = vld [vmem:[%s6197_s0 + $0xcc] sm:$0x1]  ;;  %v1465_v45 = vshrl.u32 %v3943_v53, 16  ;;  %v766_v39 = vpop.permute.xlu0 %765 }
  0xa3   :  { %v1421_v62 = vsel %vm5106_vm4, %v1416_v55, %v1420_v26  ;;  %v1453_v58 = vrot.slane %v1451_v38, 4  ;;  %v1456_v49 = vrot.slane %v1454_v47, 5  ;;  %v1460_v31 = vshll.u32 %v3942_v44, 16  ;;  %v3945_v60 = vld [vmem:[%s6197_s0 + $0xd8] sm:$0xf] }
  0xa4   :  { %v5911_v37 = vld [vmem:[%s6198_s1 + $0x18] sm:$0x3]  ;;  %v5913_v56 = vcombine.low %v1407_v16, %v1421_v62  ;;  %v1443_v23 = vor.u32 %v1442_v51, %v1439_v15  ;;  %v1448_v3 = vrot.slane %v1446_v10, 5  ;;  %v3946_v5 = vld [vmem:[%s6197_s0 + $0xdc] sm:$0x1]  ;;  %v1467_v4 = vrot.slane %v1465_v45, 4 }
  0xa5   :  { %v1457_v22 = vor.u32 %v1456_v49, %v1453_v58  ;;  %v1468_v26 = vshll.u32 %v3943_v53, 16  ;;  %v1474_v18 = vshll.u32 %v3944_v19, 16  ;;  %v3947_v28 = vld [vmem:[%s6197_s0 + $0xe8] sm:$0xf]  ;;  %v1435_v15 = vsel %vm5106_vm4, %v1430_v46, %v1434_v34  ;;  %v4956_v38 = vld [vmem:[%s6197_s0 + $0xd0] ss:$16 sps:$4 sm:$0xff]  }
  0xa6   :  { %4553 = vmatmul.mubr.msk.bf16.vlgmr.msra.gmra.mrb[0].mxu0 %vm88_vm2, %v5169_v27  ;;  %v1444_v0 = vrot.slane %v1443_v23, 4  ;;  %v1479_v10 = vshrl.u32 %v3945_v60, 16  ;;  %v1482_v44 = vshll.u32 %v3945_v60, 16  ;;  %v4955_v27 = vld [vmem:[%s6197_s0 + $0xb0] ss:$16 sps:$4 sm:$0xff]   ;;  %v1462_v16 = vrot.slane %v1460_v31, 5  ;;  %1708 = vrot.lane.b32.xlu0 %v5913_v56, %s4992_s11 }
  0xa7   :  { %4556 = vmatprep.mubr.msk.bf16.mxu0 %vm88_vm2, %v5191_v59  ;;  %4569 = vmatpush3.bf16.msra.mxu0 %v2680_v14  ;;  %v1458_v53 = vrot.slane %v1457_v22, 4  ;;  %v1470_v55 = vrot.slane %v1468_v26, 5  ;;  %v3948_v59 = vld [vmem:[%s6197_s0 + $0xec] sm:$0x1]  ;;  %v1488_v14 = vshll.u32 %v3946_v5, 16  ;;  %v1493_v51 = vshrl.u32 %v3947_v28, 16 }
  0xa8   :  { %4910 = vmatprep.subr.msk.bf16.mxu0 %vm113_vm3, %v5911_v37  ;;  %v1449_v47 = vsel %vm5106_vm4, %v1444_v0, %v1448_v3  ;;  %v1481_v46 = vrot.slane %v1479_v10, 4  ;;  %v1484_v34 = vrot.slane %v1482_v44, 5  ;;  %v3949_v19 = vld [vmem:[%s6197_s0 + $0xf8] sm:$0xf]  ;;  %v1476_v58 = vrot.slane %v1474_v18, 5 }
  0xa9   :  { %4399 = vmatmul.mubr.msk.bf16.gmra.mrb[8].mxu1 %vm88_vm2, %v4955_v27  ;;  %v5947_v45 = vcombine.low %v1435_v15, %v1449_v47  ;;  %v1471_v62 = vor.u32 %v1470_v55, %v1467_v4  ;;  %v3951_v49 = vld [vmem:[%s6197_s0 + $0x108] sm:$0xf]  ;;  %v1495_v60 = vrot.slane %v1493_v51, 4  ;;  %v1496_v23 = vshll.u32 %v3947_v28, 16  ;;  %v3950_v3 = vld [vmem:[%s6197_s0 + $0xfc] sm:$0x1] }
  0xaa   :  { %4402 = vmatprep.mubr.msk.bf16.mxu1 %vm88_vm2, %v4956_v38  ;;  %v1485_v31 = vor.u32 %v1484_v34, %v1481_v46  ;;  %v1502_v5 = vshll.u32 %v3948_v59, 16  ;;  %v1463_v22 = vsel %vm5106_vm4, %v1458_v53, %v1462_v16  ;;  %v1507_v15 = vshrl.u32 %v3949_v19, 16  ;;  %v3952_v28 = vld [vmem:[%s6197_s0 + $0x10c] sm:$0x1]  ;;  %v4957_v47 = vld [vmem:[%s6197_s0 + $0xf0] ss:$16 sps:$4 sm:$0xff]  }
  0xab   :  { %v1472_v26 = vrot.slane %v1471_v62, 4  ;;  %v1510_v0 = vshll.u32 %v3949_v19, 16  ;;  %1710 = vrot.lane.b32.xlu0 %v5947_v45, %s4992_s11  ;;  %v1490_v18 = vrot.slane %v1488_v14, 5  ;;  %v1498_v10 = vrot.slane %v1496_v23, 5  ;;  %v2640_v19 = vpop.permute.xlu1 %2639 }
  0xac   :  { %v1486_v4 = vrot.slane %v1485_v31, 4  ;;  %v1521_v44 = vshrl.u32 %v3951_v49, 16  ;;  %v1509_v53 = vrot.slane %v1507_v15, 4  ;;  %v1516_v55 = vshll.u32 %v3950_v3, 16 }
  0xad   :  { %v1477_v27 = vsel %vm5106_vm4, %v1472_v26, %v1476_v58  ;;  %v1512_v16 = vrot.slane %v1510_v0, 5  ;;  %v1499_v14 = vor.u32 %v1498_v10, %v1495_v60  ;;  %v1504_v38 = vrot.slane %v1502_v5, 5  ;;  %v3895_v0 = vld [vmem:[%s6198_s1 + $0x8] sm:$0x3] }
  0xae   :  { %4557 = vmatmul.mubr.msk.bf16.gmra.mrb[4].mxu0 %vm88_vm2, %v5214_v25  ;;  %v5968_v59 = vcombine.low %v1463_v22, %v1477_v27  ;;  %v1523_v46 = vrot.slane %v1521_v44, 4  ;;  %v1524_v34 = vshll.u32 %v3951_v49, 16  ;;  %v1530_v51 = vshll.u32 %v3952_v28, 16  ;;  %v4958_v44 = vld [vmem:[%s6197_s0 + $0x18] ss:$16 sps:$4 sm:$0xff]  }
  0xaf   :  { %4560 = vmatprep.mubr.msk.bf16.mxu0 %vm88_vm2, %v5233_v48  ;;  %v1513_v25 = vor.u32 %v1512_v16, %v1509_v53  ;;  %v1491_v48 = vsel %vm5106_vm4, %v1486_v4, %v1490_v18  ;;  %v1500_v62 = vrot.slane %v1499_v14, 4  ;;  %v1518_v31 = vrot.slane %v1516_v55, 5  ;;  %v2642_v15 = vpop.permute.xlu1 %2641  ;;  %v4112_v4 = vld [vmem:[%s6198_s1 + $0x1a] sm:$0x3]  ;;  %v4153_v16 = vld [vmem:[%s6198_s1 + $0x1c] sm:$0x3] }
  0xb0   :  { %1712 = vrot.lane.b32.xlu0 %v5968_v59, %s4992_s11  ;;  %v1526_v60 = vrot.slane %v1524_v34, 5  ;;  %v1532_v3 = vrot.slane %v1530_v51, 5  ;;  %v1005_v10 = vsel %vm113_vm3, %v3895_v0, 0  ;;  %v3037_v53 = vsel %vm113_vm3, %v4112_v4, 0  ;;  %v4959_v55 = vld [vmem:[%s6197_s0 + $0x38] ss:$16 sps:$4 sm:$0xff]  }
  0xb1   :  { %4403 = vmatmul.mubr.msk.bf16.gmra.mrb[12].mxu1 %vm88_vm2, %v4957_v47  ;;  %v1514_v58 = vrot.slane %v1513_v25, 4  ;;  %v1505_v23 = vsel %vm5106_vm4, %v1500_v62, %v1504_v38  ;;  %v4960_v38 = vld [vmem:[%s6197_s0 + $0x58] ss:$16 sps:$4 sm:$0xff]  }
  0xb2   :  { %4408 = vmatprep.mubr.msk.bf16.mxu1 %vm88_vm2, %v5262_v17  ;;  %v5982_v5 = vcombine.low %v1491_v48, %v1505_v23  ;;  %v1527_v49 = vor.u32 %v1526_v60, %v1523_v46  ;;  %v806_v17 = vsel %vm113_vm3, %v5825_v41, 0  ;;  %v4961_v25 = vld [vmem:[%s6197_s0 + $0x78] ss:$16 sps:$4 sm:$0xff]  }
  0xb3   :  { %v1519_v22 = vsel %vm5106_vm4, %v1514_v58, %v1518_v31  ;;  %v4962_v46 = vld [vmem:[%s6197_s0 + $0xa8] ss:$16 sps:$4 sm:$0xff]   ;;  %v3953_v31 = vld [vmem:[%s6198_s1 + $0xc] sm:$0x3] }
  0xb4   :  { %1714 = vrot.lane.b32.xlu0 %v5982_v5, %s4992_s11  ;;  %v1528_v26 = vrot.slane %v1527_v49, 4  ;;  %v4963_v34 = vld [vmem:[%s6197_s0 + $0x8] ss:$16 sps:$4 sm:$0xff]  }
  0xb5   :  { %v4965_v62 = vld [vmem:[%s6197_s0 + $0xe8] ss:$16 sps:$4 sm:$0xff]  }
  0xb6   :  { %4561 = vmatmul.mubr.msk.bf16.gmra.mrb[8].mxu0 %vm88_vm2, %v5282_v43  ;;  %v1533_v43 = vsel %vm5106_vm4, %v1528_v26, %v1532_v3  ;;  %v4966_v60 = vld [vmem:[%s6197_s0 + $0x28] ss:$16 sps:$4 sm:$0xff]  }
  0xb7   :  { %4564 = vmatprep.mubr.msk.bf16.mxu0 %vm88_vm2, %v5347_v40  ;;  %v6003_v41 = vcombine.low %v1519_v22, %v1533_v43  ;;  %v2644_v40 = vpop.permute.xlu1 %2643  ;;  %v4967_v49 = vld [vmem:[%s6197_s0 + $0x108] ss:$16 sps:$4 sm:$0xff]   ;;  %v4170_v22 = vld [vmem:[%s6198_s1 + $0x1e] sm:$0x3]  ;;  %v1585_v43 = vsel %vm113_vm3, %v3953_v31, 0 }
  0xb9   :  { %4409 = vmatmul.mubr.msk.bf16.vlgmr.msra.gmra.mrb[0].mxu1 %vm88_vm2, %v5313_v6  ;;  %1716 = vrot.lane.b32.xlu0 %v6003_v41, %s4992_s11 }
  0xba   :  { %4425 = vmatpush3.bf16.msra.mxu1 %v806_v17  ;;  %4412 = vmatprep.mubr.msk.bf16.mxu1 %vm88_vm2, %v5367_v1  ;;  %v2879_v1 = vsel %vm113_vm3, %v5911_v37, 0 }
  0xbb   :  { %4902 = vmatprep.subr.msk.bf16.mxu1 %vm113_vm3, %v3895_v0  ;;  %v2646_v6 = vpop.permute.xlu1 %2645 }
  0xbe   :  { %4565 = vmatmul.mubr.msk.bf16.gmra.mrb[12].mxu0 %vm88_vm2, %v5394_v35  ;;  %v768_v35 = vpop.permute.xlu0 %767 }
  0xbf   :  { %4570 = vmatprep.mubr.msk.bf16.mxu0 %vm88_vm2, %v2640_v19  ;;  %v4964_v19 = vld [vmem:[%s6197_s0 + $0xc8] ss:$16 sps:$4 sm:$0xff]  }
  0xc1   :  { %4413 = vmatmul.mubr.msk.bf16.gmra.mrb[4].mxu1 %vm88_vm2, %v5421_v57  ;;  %v2648_v57 = vpop.permute.xlu1 %2647 }
  0xc2   :  { %4416 = vmatprep.mubr.msk.bf16.mxu1 %vm88_vm2, %v5451_v24  ;;  %v770_v24 = vpop.permute.xlu0 %769 }
  0xc5   :  { %v2650_v37 = vpop.permute.xlu1 %2649 }
  0xc6   :  { %4571 = vmatmul.mubr.msk.bf16.vlgmr.msra.gmra.mrb[0].mxu0 %vm88_vm2, %v2642_v15  ;;  %v772_v18 = vpop.permute.xlu0 %771 }
  0xc7   :  { %4574 = vmatprep.mubr.msk.bf16.mxu0 %vm88_vm2, %v2644_v40  ;;  %4587 = vmatpush3.bf16.msra.mxu0 %v2879_v1 }
  0xc8   :  { %4911 = vmatprep.subr.msk.bf16.mxu0 %vm113_vm3, %v4112_v4 }
  0xc9   :  { %4417 = vmatmul.mubr.msk.bf16.gmra.mrb[8].mxu1 %vm88_vm2, %v5469_v52  ;;  %v2652_v52 = vpop.permute.xlu1 %2651 }
  0xca   :  { %4420 = vmatprep.mubr.msk.bf16.mxu1 %vm88_vm2, %v5485_v11  ;;  %v3912_v11 = vld [vmem:[%s6198_s1 + $0xa] sm:$0x3] }
  0xcb   :  { %v1163_v48 = vsel %vm113_vm3, %v3912_v11, 0 }
  0xcd   :  { %v2654_v28 = vpop.permute.xlu1 %2653 }
  0xce   :  { %4575 = vmatmul.mubr.msk.bf16.gmra.mrb[4].mxu0 %vm88_vm2, %v2646_v6  ;;  %v3617_v6 = vsel %vm113_vm3, %v4170_v22, 0 }
  0xcf   :  { %4578 = vmatprep.mubr.msk.bf16.mxu0 %vm88_vm2, %v2648_v57 }
  0xd1   :  { %4421 = vmatmul.mubr.msk.bf16.gmra.mrb[12].mxu1 %vm88_vm2, %v5506_v21  ;;  %v774_v21 = vpop.permute.xlu0 %773  ;;  %v2997_v51 = vpop.permute.xlu1 %2996 }
  0xd2   :  { %4426 = vmatprep.mubr.msk.bf16.mxu1 %vm88_vm2, %v766_v39 }
  0xd5   :  { %v776_v27 = vpop.permute.xlu0 %775  ;;  %v2999_v58 = vpop.permute.xlu1 %2998 }
  0xd6   :  { %4579 = vmatmul.mubr.msk.bf16.gmra.mrb[8].mxu0 %vm88_vm2, %v2650_v37 }
  0xd7   :  { %4582 = vmatprep.mubr.msk.bf16.mxu0 %vm88_vm2, %v2652_v52 }
  0xd9   :  { %4427 = vmatmul.mubr.msk.bf16.vlgmr.msra.gmra.mrb[0].mxu1 %vm88_vm2, %v768_v35  ;;  %v778_v14 = vpop.permute.xlu0 %777  ;;  %v3001_v23 = vpop.permute.xlu1 %3000 }
  0xda   :  { %4443 = vmatpush3.bf16.msra.mxu1 %v1005_v10  ;;  %4430 = vmatprep.mubr.msk.bf16.mxu1 %vm88_vm2, %v770_v24 }
  0xdb   :  { %4903 = vmatprep.subr.msk.bf16.mxu1 %vm113_vm3, %v3912_v11 }
  0xdd   :  { %v780_v47 = vpop.permute.xlu0 %779  ;;  %v3003_v17 = vpop.permute.xlu1 %3002 }
  0xde   :  { %4583 = vmatmul.mubr.msk.bf16.gmra.mrb[12].mxu0 %vm88_vm2, %v2654_v28 }
  0xdf   :  { %4588 = vmatprep.mubr.msk.bf16.mxu0 %vm88_vm2, %v4958_v44 }
  0xe1   :  { %4431 = vmatmul.mubr.msk.bf16.gmra.mrb[4].mxu1 %vm88_vm2, %v772_v18  ;;  %v1123_v3 = vpop.permute.xlu0 %1122 }
  0xe2   :  { %4434 = vmatprep.mubr.msk.bf16.mxu1 %vm88_vm2, %v774_v21 }
  0xe6   :  { %4589 = vmatmul.mubr.msk.bf16.vlgmr.msra.gmra.mrb[0].mxu0 %vm88_vm2, %v4959_v55 }
  0xe7   :  { %4592 = vmatprep.mubr.msk.bf16.mxu0 %vm88_vm2, %v4960_v38  ;;  %4605 = vmatpush3.bf16.msra.mxu0 %v3037_v53 }
  0xe8   :  { %4912 = vmatprep.subr.msk.bf16.mxu0 %vm113_vm3, %v4153_v16 }
  0xe9   :  { %4435 = vmatmul.mubr.msk.bf16.gmra.mrb[8].mxu1 %vm88_vm2, %v776_v27 }
  0xea   :  { %4438 = vmatprep.mubr.msk.bf16.mxu1 %vm88_vm2, %v778_v14 }
  0xee   :  { %4593 = vmatmul.mubr.msk.bf16.gmra.mrb[4].mxu0 %vm88_vm2, %v4961_v25 }
  0xef   :  { %4596 = vmatprep.mubr.msk.bf16.mxu0 %vm88_vm2, %v4962_v46 }
  0xf1   :  { %4439 = vmatmul.mubr.msk.bf16.gmra.mrb[12].mxu1 %vm88_vm2, %v780_v47 }
  0xf2   :  { %4444 = vmatprep.mubr.msk.bf16.mxu1 %vm88_vm2, %v4963_v34 }
  0xf6   :  { %4597 = vmatmul.mubr.msk.bf16.gmra.mrb[8].mxu0 %vm88_vm2, %v4964_v19 }
  0xf7   :  { %4600 = vmatprep.mubr.msk.bf16.mxu0 %vm88_vm2, %v4965_v62 }
  0xf9   :  { %4445 = vmatmul.mubr.msk.bf16.vlgmr.msra.gmra.mrb[0].mxu1 %vm88_vm2, %v4966_v60 }
  0xfa   :  { %4461 = vmatpush3.bf16.msra.mxu1 %v1163_v48  ;;  %4448 = vmatprep.mubr.msk.bf16.mxu1 %vm88_vm2, %v5566_v30  ;;  %v3459_v30 = vsel %vm113_vm3, %v4153_v16, 0 }
  0xfb   :  { %4904 = vmatprep.subr.msk.bf16.mxu1 %vm113_vm3, %v3953_v31 }
  0xfe   :  { %4601 = vmatmul.mubr.msk.bf16.gmra.mrb[12].mxu0 %vm88_vm2, %v4967_v49 }
  0xff   :  { %4606 = vmatprep.mubr.msk.bf16.mxu0 %vm88_vm2, %v2997_v51 }
 0x101   :  { %4449 = vmatmul.mubr.msk.bf16.gmra.mrb[4].mxu1 %vm88_vm2, %v5598_v13  ;;  %v1125_v13 = vpop.permute.xlu0 %1124 }
 0x102   :  { %4452 = vmatprep.mubr.msk.bf16.mxu1 %vm88_vm2, %v5624_v29  ;;  %v3005_v29 = vpop.permute.xlu1 %3004 }
 0x105   :  { %v1127_v26 = vpop.permute.xlu0 %1126 }
 0x106   :  { %4607 = vmatmul.mubr.msk.bf16.vlgmr.msra.gmra.mrb[0].mxu0 %vm88_vm2, %v2999_v58  ;;  %v3007_v15 = vpop.permute.xlu1 %3006 }
 0x107   :  { %4610 = vmatprep.mubr.msk.bf16.mxu0 %vm88_vm2, %v3001_v23  ;;  %4623 = vmatpush3.bf16.msra.mxu0 %v3459_v30 }
 0x108   :  { %4913 = vmatprep.subr.msk.bf16.mxu0 %vm113_vm3, %v4170_v22 }
 0x109   :  { %4453 = vmatmul.mubr.msk.bf16.gmra.mrb[8].mxu1 %vm88_vm2, %v5639_v54  ;;  %v1129_v0 = vpop.permute.xlu0 %1128 }
 0x10a   :  { %4456 = vmatprep.mubr.msk.bf16.mxu1 %vm88_vm2, %v5677_v32  ;;  %v3009_v54 = vpop.permute.xlu1 %3008  ;;  %v3970_v32 = vld [vmem:[%s6198_s1 + $0xe] sm:$0x3]  ;;  %s4993_s1 = smov [#allocation2]  }
 0x10b   :  { %s3817_s17 = sshll.u32 %s4993_s1, 4  ;;  %s3818_s17 = int_to_ptr.vmem [resolvable:$true] %s3817_s17 }
 0x10c   :  { %s4968_s18 = scalar_lea.vmem %s3818_s17, 1024  ;;  %p4973_p1 = scmp.lt.s32.totalorder %s3818_s17, %s3818_s17 }
 0x10d   :  { %p4969_p0 = scmp.ne.s32.totalorder %s3818_s17, %s4968_s18  ;;  %p4974_p2 = scmp.lt.s32.totalorder %s4968_s18, %s4968_s18 }
 0x10e   :  { %4611 = vmatmul.mubr.msk.bf16.gmra.mrb[4].mxu0 %vm88_vm2, %v3003_v17  ;;  %v3011_v40 = vpop.permute.xlu1 %3010 }
 0x10f   :  { %4614 = vmatprep.mubr.msk.bf16.mxu0 %vm88_vm2, %v3005_v29  ;;  %p4975_p3 = por %p4974_p2, %p4973_p1 }
 0x111   :  { %4457 = vmatmul.mubr.msk.bf16.gmra.mrb[12].mxu1 %vm88_vm2, %v5710_v7  ;;  %v1131_v7 = vpop.permute.xlu0 %1130  ;;  %p4976_p4 = pnand %p4975_p3, %p4969_p0 }
 0x112   :  { %4462 = vmatprep.mubr.msk.bf16.mxu1 %vm88_vm2, %v1123_v3 }
 0x115   :  { %v1133_v39 = vpop.permute.xlu0 %1132 }
 0x116   :  { %4615 = vmatmul.mubr.msk.bf16.gmra.mrb[8].mxu0 %vm88_vm2, %v3007_v15 }
 0x117   :  { %4618 = vmatprep.mubr.msk.bf16.mxu0 %vm88_vm2, %v3009_v54 }
 0x119   :  { %4463 = vmatmul.mubr.msk.bf16.vlgmr.msra.gmra.mrb[0].mxu1 %vm88_vm2, %v1125_v13  ;;  %v1135_v1 = vpop.permute.xlu0 %1134 }
 0x11a   :  { %4479 = vmatpush3.bf16.msra.mxu1 %v1585_v43  ;;  %4466 = vmatprep.mubr.msk.bf16.mxu1 %vm88_vm2, %v1127_v26 }
 0x11b   :  { %4905 = vmatprep.subr.msk.bf16.mxu1 %vm113_vm3, %v3970_v32 }
 0x11e   :  { %4619 = vmatmul.mubr.msk.bf16.gmra.mrb[12].mxu0 %vm88_vm2, %v3011_v40 }
 0x11f   :  { %4624 = vmatprep.mubr.msk.bf16.mxu0 %vm88_vm2, %v5576_v33  ;;  %v1137_v33 = vpop.permute.xlu0 %1136 }
 0x121   :  { %4467 = vmatmul.mubr.msk.bf16.gmra.mrb[4].mxu1 %vm88_vm2, %v1129_v0 }
 0x122   :  { %4470 = vmatprep.mubr.msk.bf16.mxu1 %vm88_vm2, %v1131_v7 }
 0x126   :  { %4625 = vmatmul.mubr.msk.bf16.vlgmr.msra.gmra.mrb[0].mxu0 %vm88_vm2, %v5607_v63  ;;  %v3577_v63 = vpop.permute.xlu1 %3576 }
 0x127   :  { %4628 = vmatprep.mubr.msk.bf16.mxu0 %vm88_vm2, %v5650_v20  ;;  %4641 = vmatpush3.bf16.msra.mxu0 %v3617_v6  ;;  %v1743_v20 = vsel %vm113_vm3, %v3970_v32, 0 }
 0x129   :  { %4471 = vmatmul.mubr.msk.bf16.gmra.mrb[8].mxu1 %vm88_vm2, %v1133_v39 }
 0x12a   :  { %4474 = vmatprep.mubr.msk.bf16.mxu1 %vm88_vm2, %v1135_v1  ;;  %v3579_v4 = vpop.permute.xlu1 %3578 }
 0x12e   :  { %4629 = vmatmul.mubr.msk.bf16.gmra.mrb[4].mxu0 %vm88_vm2, %v5679_v36  ;;  %v3581_v36 = vpop.permute.xlu1 %3580 }
 0x12f   :  { %4632 = vmatprep.mubr.msk.bf16.mxu0 %vm88_vm2, %v5712_v9  ;;  %v1703_v9 = vpop.permute.xlu0 %1702 }
 0x131   :  { %4475 = vmatmul.mubr.msk.bf16.gmra.mrb[12].mxu1 %vm88_vm2, %v1137_v33 }
 0x132   :  { %4480 = vmatprep.mubr.msk.bf16.mxu1 %vm88_vm2, %v5745_v8  ;;  %v3583_v8 = vpop.permute.xlu1 %3582 }
 0x136   :  { %4633 = vmatmul.mubr.msk.bf16.gmra.mrb[8].mxu0 %vm88_vm2, %v5772_v50  ;;  %v1705_v50 = vpop.permute.xlu0 %1704 }
 0x137   :  { %4636 = vmatprep.mubr.msk.bf16.mxu0 %vm88_vm2, %v5827_v61 }
 0x139   :  { %4481 = vmatmul.mubr.msk.bf16.vlgmr.msra.gmra.mrb[0].mxu1 %vm88_vm2, %v5797_v42  ;;  %v3585_v42 = vpop.permute.xlu1 %3584 }
 0x13a   :  { %4497 = vmatpush3.bf16.msra.mxu1 %v1743_v20  ;;  %4484 = vmatprep.mubr.msk.bf16.mxu1 %vm88_vm2, %v5855_v12  ;;  %v1707_v61 = vpop.permute.xlu0 %1706 }
 0x13d   :  { %v3587_v12 = vpop.permute.xlu1 %3586 }
 0x13e   :  { %4637 = vmatmul.mubr.msk.bf16.gmra.mrb[12].mxu0 %vm88_vm2, %v5884_v2  ;;  %v1709_v2 = vpop.permute.xlu0 %1708 }
 0x13f   :  { %4642 = vmatprep.mubr.msk.bf16.mxu0 %vm88_vm2, %v3577_v63 }
 0x141   :  { %4485 = vmatmul.mubr.msk.bf16.gmra.mrb[4].mxu1 %vm88_vm2, %v5913_v56  ;;  %v3589_v56 = vpop.permute.xlu1 %3588 }
 0x142   :  { %4488 = vmatprep.mubr.msk.bf16.mxu1 %vm88_vm2, %v5947_v45  ;;  %v1711_v45 = vpop.permute.xlu0 %1710 }
 0x146   :  { %4643 = vmatmul.mubr.msk.bf16.vlgmr.msra.gmra.mrb[0].mxu0 %vm88_vm2, %v3579_v4 }
 0x147   :  { %4646 = vmatprep.mubr.msk.bf16.mxu0 %vm88_vm2, %v3581_v36 }
 0x149   :  { %4489 = vmatmul.mubr.msk.bf16.gmra.mrb[8].mxu1 %vm88_vm2, %v5968_v59  ;;  %v3591_v59 = vpop.permute.xlu1 %3590 }
 0x14a   :  { %4492 = vmatprep.mubr.msk.bf16.mxu1 %vm88_vm2, %v5982_v5  ;;  %v1713_v5 = vpop.permute.xlu0 %1712 }
 0x14e   :  { %4647 = vmatmul.mubr.msk.bf16.gmra.mrb[4].mxu0 %vm88_vm2, %v3583_v8 }
 0x14f   :  { %4650 = vmatprep.mubr.msk.bf16.mxu0 %vm88_vm2, %v3585_v42 }
 0x151   :  { %4493 = vmatmul.mubr.msk.bf16.gmra.mrb[12].mxu1 %vm88_vm2, %v6003_v41  ;;  %v1715_v41 = vpop.permute.xlu0 %1714 }
 0x152   :  { %4498 = vmatprep.mubr.msk.bf16.mxu1 %vm88_vm2, %v1703_v9 }
 0x155   :  { %v1717_v35 = vpop.permute.xlu0 %1716 }
 0x156   :  { %4651 = vmatmul.mubr.msk.bf16.gmra.mrb[8].mxu0 %vm88_vm2, %v3587_v12 }
 0x157   :  { %4654 = vmatprep.mubr.msk.bf16.mxu0 %vm88_vm2, %v3589_v56 }
 0x159   :  { %4499 = vmatmul.mubr.msk.bf16.vlgmr.msra.gmra.mrb[0].mxu1 %vm88_vm2, %v1705_v50 }
 0x15a   :  { %4502 = vmatprep.mubr.msk.bf16.mxu1 %vm88_vm2, %v1707_v61 }
 0x15e   :  { %4655 = vmatmul.mubr.msk.bf16.gmra.mrb[12].mxu0 %vm88_vm2, %v3591_v59 }
 0x161   :  { %4503 = vmatmul.mubr.msk.bf16.gmra.mrb[4].mxu1 %vm88_vm2, %v1709_v2 }
 0x162   :  { %4506 = vmatprep.mubr.msk.bf16.mxu1 %vm88_vm2, %v1711_v45 }
 0x169   :  { %4507 = vmatmul.mubr.msk.bf16.gmra.mrb[8].mxu1 %vm88_vm2, %v1713_v5 }
 0x16a   :  { %4510 = vmatprep.mubr.msk.bf16.mxu1 %vm88_vm2, %v1715_v41 }
 0x171   :  { %4511 = vmatmul.mubr.msk.bf16.gmra.mrb[12].mxu1 %vm88_vm2, %v1717_v35 }
 0x219   :  { %v4644_v57 = vpop.f32.mrb[0].mxu0 }
 0x21a   :  { %v3653_v24 = vpop.f32.mrb[1].mxu0 }
 0x21b   :  { %v4645_v37 = vpop.f32.mrb[2].mxu0 }
 0x21c   :  { %v3656_v18 = vpop.f32.mrb[3].mxu0 }
 0x221   :  { %v4648_v52 = vpop.f32.mrb[4].mxu0 }
 0x222   :  { %v3669_v10 = vpop.f32.mrb[5].mxu0 }
 0x223   :  { %v4649_v11 = vpop.f32.mrb[6].mxu0 }
 0x224   :  { %v3672_v21 = vpop.f32.mrb[7].mxu0 }
 0x229   :  { %v4652_v28 = vpop.f32.mrb[8].mxu0 }
 0x22a   :  { %v3685_v44 = vpop.f32.mrb[9].mxu0 }
 0x22b   :  { %v4653_v27 = vpop.f32.mrb[10].mxu0 }
 0x22c   :  { %v4500_v53 = vpop.f32.mrb[0].mxu1  ;;  %v3688_v55 = vpop.f32.mrb[11].mxu0 }
 0x22d   :  { %v4658_v16 = vadd.f32 %v4644_v57, %v4500_v53  ;;  %v1779_v14 = vpop.f32.mrb[1].mxu1 }
 0x22e   :  { %v4659_v38 = vadd.f32 %v3653_v24, %v1779_v14  ;;  %v4501_v47 = vpop.f32.mrb[2].mxu1 }
 0x22f   :  { %v3750_v25 = vmul.f32 0.2, %v4658_v16  ;;  %v4660_v46 = vadd.f32 %v4645_v37, %v4501_v47  ;;  %v1782_v34 = vpop.f32.mrb[3].mxu1  ;;  %vm3734_vm5 = vcmp.gt.f32.partialorder %v4658_v16, 0.0 }
 0x230   :  { %v3748_v51 = vmul.f32 0.2, %v4659_v38  ;;  %v4661_v19 = vadd.f32 %v3656_v18, %v1782_v34  ;;  %vm3732_vm6 = vcmp.gt.f32.partialorder %v4659_v38, 0.0 }
 0x231   :  { %vm3735_vm7 = vcmp.gt.f32.partialorder %v4660_v46, 0.0  ;;  %v3751_v48 = vmul.f32 0.2, %v4660_v46  ;;  %v4656_v58 = vpop.f32.mrb[12].mxu0  ;;  %v3766_v31 = vsel %vm3734_vm5, %v4658_v16, %v3750_v25 }
 0x232   :  { %vm3733_vm8 = vcmp.gt.f32.partialorder %v4661_v19, 0.0  ;;  %v3749_v62 = vmul.f32 0.2, %v4661_v19  ;;  %v3701_v23 = vpop.f32.mrb[13].mxu0  ;;  %v3764_v49 = vsel %vm3732_vm6, %v4659_v38, %v3748_v51 }
 0x233   :  { %v3767_v60 = vsel %vm3735_vm7, %v4660_v46, %v3751_v48  ;;  %v4657_v30 = vpop.f32.mrb[14].mxu0 }
 0x234   :  { %v4187_v3 = vpack.c.bf16 %v3767_v60, %v3766_v31  ;;  %v3765_v17 = vsel %vm3733_vm8, %v4661_v19, %v3749_v62  ;;  %v4504_v22 = vpop.f32.mrb[4].mxu1  ;;  %v3704_v26 = vpop.f32.mrb[15].mxu0 }
 0x235   :  { %v4182_v13 = vpack.c.bf16 %v3765_v17, %v3764_v49  ;;  %v4662_v29 = vadd.f32 %v4648_v52, %v4504_v22  ;;  %v1795_v15 = vpop.f32.mrb[5].mxu1 }
 0x236   :  { %4219 = vst [vmem:[#allocation2 + $0x8] sm:$0xff] %v4187_v3   ;;  %v4663_v0 = vadd.f32 %v3669_v10, %v1795_v15  ;;  %v4505_v54 = vpop.f32.mrb[6].mxu1 }
 0x237   :  { %4183 = vst [vmem:[#allocation2] sm:$0xff] %v4182_v13   ;;  %v3754_v43 = vmul.f32 0.2, %v4662_v29  ;;  %v4664_v32 = vadd.f32 %v4649_v11, %v4505_v54  ;;  %v1798_v7 = vpop.f32.mrb[7].mxu1  ;;  %vm3738_vm9 = vcmp.gt.f32.partialorder %v4662_v29, 0.0 }
 0x238   :  { %v3752_v40 = vmul.f32 0.2, %v4663_v0  ;;  %v4665_v39 = vadd.f32 %v3672_v21, %v1798_v7  ;;  %vm3736_vm10 = vcmp.gt.f32.partialorder %v4663_v0, 0.0 }
 0x239   :  { %vm3739_vm11 = vcmp.gt.f32.partialorder %v4664_v32, 0.0  ;;  %v3755_v6 = vmul.f32 0.2, %v4664_v32  ;;  %v3770_v33 = vsel %vm3738_vm9, %v4662_v29, %v3754_v43 }
 0x23a   :  { %vm3737_vm12 = vcmp.gt.f32.partialorder %v4665_v39, 0.0  ;;  %v3753_v1 = vmul.f32 0.2, %v4665_v39  ;;  %v3768_v20 = vsel %vm3736_vm10, %v4663_v0, %v3752_v40 }
 0x23b   :  { %v3771_v63 = vsel %vm3739_vm11, %v4664_v32, %v3755_v6 }
 0x23c   :  { %v4197_v4 = vpack.c.bf16 %v3771_v63, %v3770_v33  ;;  %v3769_v36 = vsel %vm3737_vm12, %v4665_v39, %v3753_v1  ;;  %v4508_v9 = vpop.f32.mrb[8].mxu1 }
 0x23d   :  { %v4192_v8 = vpack.c.bf16 %v3769_v36, %v3768_v20  ;;  %v4666_v50 = vadd.f32 %v4652_v28, %v4508_v9  ;;  %v1811_v42 = vpop.f32.mrb[9].mxu1 }
 0x23e   :  { %4221 = vst [vmem:[#allocation2 + $0x18] sm:$0xff] %v4197_v4   ;;  %v4667_v61 = vadd.f32 %v3685_v44, %v1811_v42  ;;  %v4509_v12 = vpop.f32.mrb[10].mxu1 }
 0x23f   :  { %4220 = vst [vmem:[#allocation2 + $0x10] sm:$0xff] %v4192_v8   ;;  %v3758_v2 = vmul.f32 0.2, %v4666_v50  ;;  %v4668_v56 = vadd.f32 %v4653_v27, %v4509_v12  ;;  %v1814_v45 = vpop.f32.mrb[11].mxu1  ;;  %vm3742_vm13 = vcmp.gt.f32.partialorder %v4666_v50, 0.0 }
 0x240   :  { %v3756_v59 = vmul.f32 0.2, %v4667_v61  ;;  %v4669_v5 = vadd.f32 %v3688_v55, %v1814_v45  ;;  %vm3740_vm14 = vcmp.gt.f32.partialorder %v4667_v61, 0.0 }
 0x241   :  { %vm3743_vm15 = vcmp.gt.f32.partialorder %v4668_v56, 0.0  ;;  %v3759_v41 = vmul.f32 0.2, %v4668_v56  ;;  %v3774_v57 = vsel %vm3742_vm13, %v4666_v50, %v3758_v2 }
 0x242   :  { %vm3741_vm0 = vcmp.gt.f32.partialorder %v4669_v5, 0.0  ;;  %v3757_v35 = vmul.f32 0.2, %v4669_v5  ;;  %v3772_v37 = vsel %vm3740_vm14, %v4667_v61, %v3756_v59 }
 0x243   :  { %v3775_v24 = vsel %vm3743_vm15, %v4668_v56, %v3759_v41 }
 0x244   :  { %v4207_v18 = vpack.c.bf16 %v3775_v24, %v3774_v57  ;;  %v3773_v52 = vsel %vm3741_vm0, %v4669_v5, %v3757_v35  ;;  %v4512_v10 = vpop.f32.mrb[12].mxu1 }
 0x245   :  { %v4202_v11 = vpack.c.bf16 %v3773_v52, %v3772_v37  ;;  %v4670_v21 = vadd.f32 %v4656_v58, %v4512_v10  ;;  %v1827_v28 = vpop.f32.mrb[13].mxu1 }
 0x246   :  { %4223 = vst [vmem:[#allocation2 + $0x28] sm:$0xff] %v4207_v18   ;;  %v4671_v44 = vadd.f32 %v3701_v23, %v1827_v28  ;;  %v4513_v27 = vpop.f32.mrb[14].mxu1 }
 0x247   :  { %4222 = vst [vmem:[#allocation2 + $0x20] sm:$0xff] %v4202_v11   ;;  %v3762_v53 = vmul.f32 0.2, %v4670_v21  ;;  %v4672_v16 = vadd.f32 %v4657_v30, %v4513_v27  ;;  %v1830_v55 = vpop.f32.mrb[15].mxu1  ;;  %vm3746_vm1 = vcmp.gt.f32.partialorder %v4670_v21, 0.0 }
 0x248   :  { %v3760_v14 = vmul.f32 0.2, %v4671_v44  ;;  %v4673_v38 = vadd.f32 %v3704_v26, %v1830_v55  ;;  %vm3744_vm2 = vcmp.gt.f32.partialorder %v4671_v44, 0.0 }
 0x249   :  { %vm3747_vm3 = vcmp.gt.f32.partialorder %v4672_v16, 0.0  ;;  %v3763_v47 = vmul.f32 0.2, %v4672_v16  ;;  %v3778_v46 = vsel %vm3746_vm1, %v4670_v21, %v3762_v53 }
 0x24a   :  { %vm3745_vm4 = vcmp.gt.f32.partialorder %v4673_v38, 0.0  ;;  %v3761_v25 = vmul.f32 0.2, %v4673_v38  ;;  %v3776_v51 = vsel %vm3744_vm2, %v4671_v44, %v3760_v14 }
 0x24b   :  { %v3779_v34 = vsel %vm3747_vm3, %v4672_v16, %v3763_v47 }
 0x24c   :  { %v4217_v19 = vpack.c.bf16 %v3779_v34, %v3778_v46  ;;  %v3777_v48 = vsel %vm3745_vm4, %v4673_v38, %v3761_v25 }
 0x24d   :  { %v4212_v62 = vpack.c.bf16 %v3777_v48, %v3776_v51 }
 0x24e   :  { %4225 = vst [vmem:[#allocation2 + $0x38] sm:$0xff] %v4217_v19  }
 0x24f   :  { %4224 = vst [vmem:[#allocation2 + $0x30] sm:$0xff] %v4212_v62  }
 0x250   :  { %4979 = shalt.err (!%p4976_p4)
}
 0x251   :  { %s4980_s21 = scalar_lea.hbm %s6199_s2, 1024 }
 0x252   :  { %p4981_p5 = scmp.ne.s32.totalorder %s6199_s2, %s4980_s21  ;;  %p4984_p6 = scmp.lt.u32.totalorder %s4980_s21, %s6199_s2 }
 0x254   :  { %p4986_p7 = pnand %p4984_p6, %p4981_p5 }
 0x256   :  { %4989 = shalt.err (!%p4986_p7)
}
 0x257   :  { %s4994_s26 = smov 64   ;;  %s4995_s27 = smov 4  }
 0x258   :  { %3823 = dma.vmem_to_hbm [thread:$0]  %s3818_s17, 1024, %s6199_s2, [#allocation3], %s4994_s26, %s4994_s26, %s4995_s27  }
 0x259   :  { %4990 = dma.done.wait [#allocation3], 1024  }
 0x25a   :  { %4991 = vsyncadd [#allocation3], 4294966272 }
 0x25b   :  { %3827 = vsyncpa [#allocation3], 1 }

</bundles_post_ra>
